<compile_context>
chip_gen: v6e
topology: v6e:2x2x1
jax: 0.10.0
libtpu: 0.0.40
codegen_flags: <defaults>
</compile_context>

<pallas_src>
import functools

import jax
import jax.numpy as jnp
import numpy as np
from jax import lax
from jax.experimental import pallas as pl
from jax.experimental.pallas import tpu as pltpu


def _round_up(n, m):
    return ((n + m - 1) // m) * m


# ----------------------------- fused forward kernel -----------------------------
def _fused_forward_kernel(
    x_ref,        # (Cp1, H*W)   f32   input image, channel-major flatten, zero-padded channels
    hh_ref,       # (Cp,  H*W)   int32 row index of each flat position (pre-broadcast)
    ww_ref,       # (Cp,  H*W)   int32 col index of each flat position
    w1_ref,       # (Cp2, 9*Cp1) bf16  conv1 weights, column = (kh*3+kw)*Cp1 + cin
    b1_ref,       # (Cp2, 1)     f32
    w2_ref,       # (Cp2, 9*Cp2) bf16  conv2 weights
    b2_ref,       # (Cp2, 1)     f32
    wf1_hbm,      # (Cmid*H*W, hidden) bf16, lives in HBM (pl.ANY), DMA'd manually
    bf1_ref,      # (1, hidden)  f32
    wf2_ref,      # (hidden, ncls) bf16
    bf2_ref,      # (1, ncls)    f32
    o_ref,        # (1, ncls)    f32
    wf1_vmem,     # (Cmid*H*W, hidden) bf16 VMEM landing buffer for the FC1 weight
    pool_ref,     # (Cp2, H*W)   f32   pooled activation
    flat_ref,     # (1, Cmid*H*W) f32  NCHW-flattened pooled activation (lane dense)
    dma_sem,      # DMA semaphore for the wf1 copy
    *, H, W, Cmid):
    hw = H * W

    # Kick off the FC1 weight DMA immediately; it overlaps conv1/conv2/pool.
    wf1_copy = pltpu.make_async_copy(wf1_hbm, wf1_vmem, dma_sem)
    wf1_copy.start()

    # ---- tap validity masks for SAME padding (hoisted, shared by both convs)
    hh = hh_ref[...]
    ww = ww_ref[...]
    offs, conds = [], []
    for dy in (-1, 0, 1):
        for dx in (-1, 0, 1):
            offs.append(dy * W + dx)
            conds.append((hh + dy >= 0) & (hh + dy < H) &
                         (ww + dx >= 0) & (ww + dx < W))

    def conv3x3(act, w_ref, b_ref):
        # act: (C, H*W) f32; one im2col-style MXU matmul, taps built with roll.
        csize = act.shape[0]
        taps = []
        for k in range(9):
            off = offs[k]
            sh = (-off) % hw
            rolled = act if sh == 0 else pltpu.roll(act, shift=sh, axis=1)
            if off == 0:
                tap = rolled
            else:
                cond = conds[k] if conds[k].shape[0] == csize else conds[k][:csize]
                tap = jnp.where(cond, rolled, 0.0)
            taps.append(tap)
        patch = jnp.concatenate(taps, axis=0).astype(jnp.bfloat16)   # (9*C, H*W)
        y = jnp.dot(w_ref[...], patch,
                    preferred_element_type=jnp.float32) + b_ref[...]
        return jnp.maximum(y, 0.0)

    # ---- conv1 + ReLU, conv2 + ReLU (lane-dense (C, H*W) activations)
    a1 = conv3x3(x_ref[...], w1_ref, b1_ref)
    a2 = conv3x3(a1, w2_ref, b2_ref)
    # TODO(synk): register_hook / activations_hook only captures grad(a2) for
    # Grad-CAM during backward; there is no forward-pass effect to implement.

    # ---- MaxPool2d(3, stride=2): separable 3-tap max (lanes, then rows).
    # Only the stride-2 window corners are consumed downstream (non-corner rows
    # of the folded FC1 weight are zero), so roll wrap garbage never escapes.
    mw = jnp.maximum(a2, jnp.maximum(pltpu.roll(a2, shift=(-1) % hw, axis=1),
                                     pltpu.roll(a2, shift=(-2) % hw, axis=1)))
    mp = jnp.maximum(mw, jnp.maximum(pltpu.roll(mw, shift=(-W) % hw, axis=1),
                                     pltpu.roll(mw, shift=(-2 * W) % hw, axis=1)))
    pool_ref[...] = mp

    # ---- NCHW flatten: lay the Cmid channel rows along lanes of one row.
    # 8 lane-aligned (1, H*W) copies; the stride-2 subsample lives in wf1's rows.
    for c in range(Cmid):
        flat_ref[0:1, c * hw:(c + 1) * hw] = pool_ref[c:c + 1, :]

    # ---- classifier: Linear -> ReLU -> Linear, single K=Cmid*H*W MXU chain.
    wf1_copy.wait()
    flat = flat_ref[...].astype(jnp.bfloat16)                         # (1, Cmid*H*W)
    h = jnp.dot(flat, wf1_vmem[...],
                preferred_element_type=jnp.float32) + bf1_ref[...]
    h = jnp.maximum(h, 0.0)
    o_ref[...] = jnp.dot(h.astype(jnp.bfloat16), wf2_ref[...],
                         preferred_element_type=jnp.float32) + bf2_ref[...]


# ----------------------------- host-side (one-time) prep -----------------------------
def prepare_kernel_params(p, Cin, Cmid, H, W, hidden, ncls):
    """Repack weights into kernel layout (done once at param-load time)."""
    HW = H * W
    Ho = (H - 3) // 2 + 1
    Wo = (W - 3) // 2 + 1
    Cp1 = _round_up(Cin, 8)
    Cp2 = _round_up(Cmid, 8)
    Cp = max(Cp1, Cp2)
    bf16 = jnp.bfloat16

    # conv weights: HWIO (3,3,Cin,Cout) -> (Cp2, 9*Cp1) with channel zero-pad.
    w1 = np.zeros((Cp2, 9 * Cp1), np.float32)
    wc1 = np.asarray(p["w_conv1"])
    w2 = np.zeros((Cp2, 9 * Cp2), np.float32)
    wc2 = np.asarray(p["w_conv2"])
    for kh in range(3):
        for kw in range(3):
            k = kh * 3 + kw
            w1[:Cmid, k * Cp1:k * Cp1 + Cin] = wc1[kh, kw].T
            w2[:Cmid, k * Cp2:k * Cp2 + Cmid] = wc2[kh, kw].T
    b1 = np.zeros((Cp2, 1), np.float32); b1[:Cmid, 0] = np.asarray(p["b_conv1"])
    b2 = np.zeros((Cp2, 1), np.float32); b2[:Cmid, 0] = np.asarray(p["b_conv2"])

    # Fold MaxPool's stride-2 subsample + PyTorch NCHW flatten into FC1 rows:
    # row (c*H*W + 2*i*W + 2*j) <- w_fc1 row (c*Ho*Wo + i*Wo + j); rest zero.
    pos = 2 * np.repeat(np.arange(Ho), Wo) * W + 2 * np.tile(np.arange(Wo), Ho)
    wf1e = np.zeros((Cmid, HW, hidden), np.float32)
    wf1e[:, pos, :] = np.asarray(p["w_fc1"]).reshape(Cmid, Ho * Wo, hidden)
    wf1_2d = wf1e.reshape(Cmid * HW, hidden)

    # Row / col index maps for the in-kernel SAME-pad masks (pre-broadcast to
    # the full sublane height so no per-use sublane broadcast is needed).
    hh = np.broadcast_to((np.arange(HW) // W).astype(np.int32), (Cp, HW))
    ww = np.broadcast_to((np.arange(HW) % W).astype(np.int32), (Cp, HW))

    return dict(
        w1=jnp.asarray(w1, bf16), b1=jnp.asarray(b1),
        w2=jnp.asarray(w2, bf16), b2=jnp.asarray(b2),
        wf1=jnp.asarray(wf1_2d, bf16),
        bf1=jnp.asarray(p["b_fc1"]).reshape(1, hidden),
        wf2=jnp.asarray(p["w_fc2"], bf16),
        bf2=jnp.asarray(p["b_fc2"]).reshape(1, ncls),
        hh=jnp.asarray(hh), ww=jnp.asarray(ww),
        dims=(Cin, Cmid, H, W, hidden, ncls, Cp1, Cp2),
    )


# ----------------------------- full forward (cnn_grad_cam.forward) -----------------------------
def cnn_grad_cam_forward(x_nchw, kp):
    # batch must be 1: the module flattens with x.view((1, -1))
    assert x_nchw.shape[0] == 1
    Cin, Cmid, H, W, hidden, ncls, Cp1, Cp2 = kp["dims"]
    HW = H * W
    x2d = jnp.zeros((Cp1, HW), jnp.float32).at[:Cin].set(x_nchw.reshape(Cin, HW))

    kernel = functools.partial(_fused_forward_kernel, H=H, W=W, Cmid=Cmid)
    vmem = functools.partial(pl.BlockSpec, memory_space=pltpu.MemorySpace.VMEM)
    return pl.pallas_call(
        kernel,
        out_shape=jax.ShapeDtypeStruct((1, ncls), jnp.float32),
        in_specs=[vmem(), vmem(), vmem(), vmem(), vmem(), vmem(), vmem(),
                  pl.BlockSpec(memory_space=pl.ANY),       # wf1 stays in HBM
                  vmem(), vmem(), vmem()],
        out_specs=vmem(),
        scratch_shapes=[
            pltpu.VMEM((Cmid * HW, hidden), jnp.bfloat16),  # wf1 landing buffer
            pltpu.VMEM((Cp2, HW), jnp.float32),             # pooled activation
            pltpu.VMEM((1, Cmid * HW), jnp.float32),        # NCHW-flat activation
            pltpu.SemaphoreType.DMA(()),                    # wf1 DMA completion
        ],
    )(x2d, kp["hh"], kp["ww"], kp["w1"], kp["b1"], kp["w2"], kp["b2"],
      kp["wf1"], kp["bf1"], kp["wf2"], kp["bf2"])


# ----------------------------- deterministic synthetic parameters -----------------------------
def init_params(key, Cin, Cmid, H, W, hidden, num_classes):
    ks = jax.random.split(key, 8)
    Ho = (H - 3) // 2 + 1
    Wo = (W - 3) // 2 + 1
    flat = Cmid * Ho * Wo
    return dict(
        w_conv1=0.1 * jax.random.normal(ks[0], (3, 3, Cin, Cmid), jnp.float32),
        b_conv1=0.1 * jax.random.normal(ks[1], (Cmid,), jnp.float32),
        w_conv2=0.1 * jax.random.normal(ks[2], (3, 3, Cmid, Cmid), jnp.float32),
        b_conv2=0.1 * jax.random.normal(ks[3], (Cmid,), jnp.float32),
        w_fc1=0.05 * jax.random.normal(ks[4], (flat, hidden), jnp.float32),
        b_fc1=0.05 * jax.random.normal(ks[5], (hidden,), jnp.float32),
        w_fc2=0.05 * jax.random.normal(ks[6], (hidden, num_classes), jnp.float32),
        b_fc2=0.05 * jax.random.normal(ks[7], (num_classes,), jnp.float32),
    )


# ----------------------------- pure-JAX reference for verification -----------------------------
def reference_forward(x_nchw, p):
    def conv(x, w_hwio, b):
        w_oihw = jnp.transpose(w_hwio, (3, 2, 0, 1))
        y = lax.conv_general_dilated(x, w_oihw, (1, 1), ((1, 1), (1, 1)),
                                     dimension_numbers=("NCHW", "OIHW", "NCHW"))
        return jax.nn.relu(y + b.reshape(1, -1, 1, 1))
    x = conv(x_nchw, p["w_conv1"], p["b_conv1"])
    x = conv(x, p["w_conv2"], p["b_conv2"])
    x = lax.reduce_window(x, -jnp.inf, lax.max, (1, 1, 3, 3), (1, 1, 2, 2), "VALID")
    x = x.reshape(1, -1)
    x = jax.nn.relu(x @ p["w_fc1"] + p["b_fc1"])
    return x @ p["w_fc2"] + p["b_fc2"]


if __name__ == "__main__":
    Cin, Cmid, H, W, hidden, ncls = 4, 8, 16, 16, 32, 10
    key = jax.random.PRNGKey(0)
    kx, kparam = jax.random.split(key)
    # batch must be 1 (the module does x.view((1, -1)))
    x = jax.random.normal(kx, (1, Cin, H, W), jnp.float32)      # NCHW like PyTorch
    params = init_params(kparam, Cin, Cmid, H, W, hidden, ncls)
    kparams = prepare_kernel_params(params, Cin, Cmid, H, W, hidden, ncls)

    out = jax.block_until_ready(cnn_grad_cam_forward(x, kparams))
    ref = jax.block_until_ready(reference_forward(x, params))

    assert out.shape == (1, ncls), out.shape
    np.testing.assert_allclose(np.asarray(out), np.asarray(ref), rtol=2e-2, atol=2e-2)
    print("KERNEL_OK")
</pallas_src>

<mosaic_0001>
module attributes {stable_mosaic.version = 11 : i64} {
  func.func @_fused_forward_kernel(%arg0: memref<8x256xf32, #tpu.memory_space<vmem>>, %arg1: memref<8x256xi32, #tpu.memory_space<vmem>>, %arg2: memref<8x256xi32, #tpu.memory_space<vmem>>, %arg3: memref<8x72xbf16, #tpu.memory_space<vmem>>, %arg4: memref<8x1xf32, #tpu.memory_space<vmem>>, %arg5: memref<8x72xbf16, #tpu.memory_space<vmem>>, %arg6: memref<8x1xf32, #tpu.memory_space<vmem>>, %arg7: memref<2048x32xbf16, #tpu.memory_space<any>>, %arg8: memref<1x32xf32, #tpu.memory_space<vmem>>, %arg9: memref<32x10xbf16, #tpu.memory_space<vmem>>, %arg10: memref<1x10xf32, #tpu.memory_space<vmem>>, %arg11: memref<1x10xf32, #tpu.memory_space<vmem>>, %arg12: memref<2048x32xbf16, #tpu.memory_space<vmem>>, %arg13: memref<8x256xf32, #tpu.memory_space<vmem>>, %arg14: memref<1x2048xf32, #tpu.memory_space<vmem>>, %arg15: memref<!tpu.dma_semaphore, #tpu.memory_space<semaphore_mem>>) attributes {dimension_semantics = [], scalar_prefetch = 0 : i64, scratch_operands = 4 : i64, tpu.core_type = #tpu.core_type<tc>} {
    tpu.enqueue_dma source(%arg7 : memref<2048x32xbf16, #tpu.memory_space<any>>) target(%arg12 : memref<2048x32xbf16, #tpu.memory_space<vmem>>) target_semaphore(%arg15 : memref<!tpu.dma_semaphore, #tpu.memory_space<semaphore_mem>>)
    %c0 = arith.constant 0 : index
    %c0_0 = arith.constant 0 : index
    %0 = vector.load %arg1[%c0, %c0_0] : memref<8x256xi32, #tpu.memory_space<vmem>>, vector<8x256xi32>
    %c0_1 = arith.constant 0 : index
    %c0_2 = arith.constant 0 : index
    %1 = vector.load %arg2[%c0_1, %c0_2] : memref<8x256xi32, #tpu.memory_space<vmem>>, vector<8x256xi32>
    %c-1_i32 = arith.constant -1 : i32
    %2 = vector.broadcast %c-1_i32 : i32 to vector<8x256xi32>
    %3 = arith.addi %0, %2 : vector<8x256xi32>
    %c0_i32 = arith.constant 0 : i32
    %4 = vector.broadcast %c0_i32 : i32 to vector<8x256xi32>
    %5 = arith.cmpi sge, %3, %4 : vector<8x256xi32>
    %c-1_i32_3 = arith.constant -1 : i32
    %6 = vector.broadcast %c-1_i32_3 : i32 to vector<8x256xi32>
    %7 = arith.addi %0, %6 : vector<8x256xi32>
    %c16_i32 = arith.constant 16 : i32
    %8 = vector.broadcast %c16_i32 : i32 to vector<8x256xi32>
    %9 = arith.cmpi slt, %7, %8 : vector<8x256xi32>
    %10 = arith.andi %5, %9 : vector<8x256xi1>
    %c-1_i32_4 = arith.constant -1 : i32
    %11 = vector.broadcast %c-1_i32_4 : i32 to vector<8x256xi32>
    %12 = arith.addi %1, %11 : vector<8x256xi32>
    %c0_i32_5 = arith.constant 0 : i32
    %13 = vector.broadcast %c0_i32_5 : i32 to vector<8x256xi32>
    %14 = arith.cmpi sge, %12, %13 : vector<8x256xi32>
    %15 = arith.andi %10, %14 : vector<8x256xi1>
    %c-1_i32_6 = arith.constant -1 : i32
    %16 = vector.broadcast %c-1_i32_6 : i32 to vector<8x256xi32>
    %17 = arith.addi %1, %16 : vector<8x256xi32>
    %c16_i32_7 = arith.constant 16 : i32
    %18 = vector.broadcast %c16_i32_7 : i32 to vector<8x256xi32>
    %19 = arith.cmpi slt, %17, %18 : vector<8x256xi32>
    %20 = arith.andi %15, %19 : vector<8x256xi1>
    %c-1_i32_8 = arith.constant -1 : i32
    %21 = vector.broadcast %c-1_i32_8 : i32 to vector<8x256xi32>
    %22 = arith.addi %0, %21 : vector<8x256xi32>
    %c0_i32_9 = arith.constant 0 : i32
    %23 = vector.broadcast %c0_i32_9 : i32 to vector<8x256xi32>
    %24 = arith.cmpi sge, %22, %23 : vector<8x256xi32>
    %c-1_i32_10 = arith.constant -1 : i32
    %25 = vector.broadcast %c-1_i32_10 : i32 to vector<8x256xi32>
    %26 = arith.addi %0, %25 : vector<8x256xi32>
    %c16_i32_11 = arith.constant 16 : i32
    %27 = vector.broadcast %c16_i32_11 : i32 to vector<8x256xi32>
    %28 = arith.cmpi slt, %26, %27 : vector<8x256xi32>
    %29 = arith.andi %24, %28 : vector<8x256xi1>
    %c0_i32_12 = arith.constant 0 : i32
    %30 = vector.broadcast %c0_i32_12 : i32 to vector<8x256xi32>
    %31 = arith.addi %1, %30 : vector<8x256xi32>
    %c0_i32_13 = arith.constant 0 : i32
    %32 = vector.broadcast %c0_i32_13 : i32 to vector<8x256xi32>
    %33 = arith.cmpi sge, %31, %32 : vector<8x256xi32>
    %34 = arith.andi %29, %33 : vector<8x256xi1>
    %c0_i32_14 = arith.constant 0 : i32
    %35 = vector.broadcast %c0_i32_14 : i32 to vector<8x256xi32>
    %36 = arith.addi %1, %35 : vector<8x256xi32>
    %c16_i32_15 = arith.constant 16 : i32
    %37 = vector.broadcast %c16_i32_15 : i32 to vector<8x256xi32>
    %38 = arith.cmpi slt, %36, %37 : vector<8x256xi32>
    %39 = arith.andi %34, %38 : vector<8x256xi1>
    %c-1_i32_16 = arith.constant -1 : i32
    %40 = vector.broadcast %c-1_i32_16 : i32 to vector<8x256xi32>
    %41 = arith.addi %0, %40 : vector<8x256xi32>
    %c0_i32_17 = arith.constant 0 : i32
    %42 = vector.broadcast %c0_i32_17 : i32 to vector<8x256xi32>
    %43 = arith.cmpi sge, %41, %42 : vector<8x256xi32>
    %c-1_i32_18 = arith.constant -1 : i32
    %44 = vector.broadcast %c-1_i32_18 : i32 to vector<8x256xi32>
    %45 = arith.addi %0, %44 : vector<8x256xi32>
    %c16_i32_19 = arith.constant 16 : i32
    %46 = vector.broadcast %c16_i32_19 : i32 to vector<8x256xi32>
    %47 = arith.cmpi slt, %45, %46 : vector<8x256xi32>
    %48 = arith.andi %43, %47 : vector<8x256xi1>
    %c1_i32 = arith.constant 1 : i32
    %49 = vector.broadcast %c1_i32 : i32 to vector<8x256xi32>
    %50 = arith.addi %1, %49 : vector<8x256xi32>
    %c0_i32_20 = arith.constant 0 : i32
    %51 = vector.broadcast %c0_i32_20 : i32 to vector<8x256xi32>
    %52 = arith.cmpi sge, %50, %51 : vector<8x256xi32>
    %53 = arith.andi %48, %52 : vector<8x256xi1>
    %c1_i32_21 = arith.constant 1 : i32
    %54 = vector.broadcast %c1_i32_21 : i32 to vector<8x256xi32>
    %55 = arith.addi %1, %54 : vector<8x256xi32>
    %c16_i32_22 = arith.constant 16 : i32
    %56 = vector.broadcast %c16_i32_22 : i32 to vector<8x256xi32>
    %57 = arith.cmpi slt, %55, %56 : vector<8x256xi32>
    %58 = arith.andi %53, %57 : vector<8x256xi1>
    %c0_i32_23 = arith.constant 0 : i32
    %59 = vector.broadcast %c0_i32_23 : i32 to vector<8x256xi32>
    %60 = arith.addi %0, %59 : vector<8x256xi32>
    %c0_i32_24 = arith.constant 0 : i32
    %61 = vector.broadcast %c0_i32_24 : i32 to vector<8x256xi32>
    %62 = arith.cmpi sge, %60, %61 : vector<8x256xi32>
    %c0_i32_25 = arith.constant 0 : i32
    %63 = vector.broadcast %c0_i32_25 : i32 to vector<8x256xi32>
    %64 = arith.addi %0, %63 : vector<8x256xi32>
    %c16_i32_26 = arith.constant 16 : i32
    %65 = vector.broadcast %c16_i32_26 : i32 to vector<8x256xi32>
    %66 = arith.cmpi slt, %64, %65 : vector<8x256xi32>
    %67 = arith.andi %62, %66 : vector<8x256xi1>
    %c-1_i32_27 = arith.constant -1 : i32
    %68 = vector.broadcast %c-1_i32_27 : i32 to vector<8x256xi32>
    %69 = arith.addi %1, %68 : vector<8x256xi32>
    %c0_i32_28 = arith.constant 0 : i32
    %70 = vector.broadcast %c0_i32_28 : i32 to vector<8x256xi32>
    %71 = arith.cmpi sge, %69, %70 : vector<8x256xi32>
    %72 = arith.andi %67, %71 : vector<8x256xi1>
    %c-1_i32_29 = arith.constant -1 : i32
    %73 = vector.broadcast %c-1_i32_29 : i32 to vector<8x256xi32>
    %74 = arith.addi %1, %73 : vector<8x256xi32>
    %c16_i32_30 = arith.constant 16 : i32
    %75 = vector.broadcast %c16_i32_30 : i32 to vector<8x256xi32>
    %76 = arith.cmpi slt, %74, %75 : vector<8x256xi32>
    %77 = arith.andi %72, %76 : vector<8x256xi1>
    %c0_i32_31 = arith.constant 0 : i32
    %78 = vector.broadcast %c0_i32_31 : i32 to vector<8x256xi32>
    %79 = arith.addi %0, %78 : vector<8x256xi32>
    %c0_i32_32 = arith.constant 0 : i32
    %80 = vector.broadcast %c0_i32_32 : i32 to vector<8x256xi32>
    %81 = arith.cmpi sge, %79, %80 : vector<8x256xi32>
    %c0_i32_33 = arith.constant 0 : i32
    %82 = vector.broadcast %c0_i32_33 : i32 to vector<8x256xi32>
    %83 = arith.addi %0, %82 : vector<8x256xi32>
    %c16_i32_34 = arith.constant 16 : i32
    %84 = vector.broadcast %c16_i32_34 : i32 to vector<8x256xi32>
    %85 = arith.cmpi slt, %83, %84 : vector<8x256xi32>
    %86 = arith.andi %81, %85 : vector<8x256xi1>
    %c1_i32_35 = arith.constant 1 : i32
    %87 = vector.broadcast %c1_i32_35 : i32 to vector<8x256xi32>
    %88 = arith.addi %1, %87 : vector<8x256xi32>
    %c0_i32_36 = arith.constant 0 : i32
    %89 = vector.broadcast %c0_i32_36 : i32 to vector<8x256xi32>
    %90 = arith.cmpi sge, %88, %89 : vector<8x256xi32>
    %91 = arith.andi %86, %90 : vector<8x256xi1>
    %c1_i32_37 = arith.constant 1 : i32
    %92 = vector.broadcast %c1_i32_37 : i32 to vector<8x256xi32>
    %93 = arith.addi %1, %92 : vector<8x256xi32>
    %c16_i32_38 = arith.constant 16 : i32
    %94 = vector.broadcast %c16_i32_38 : i32 to vector<8x256xi32>
    %95 = arith.cmpi slt, %93, %94 : vector<8x256xi32>
    %96 = arith.andi %91, %95 : vector<8x256xi1>
    %c1_i32_39 = arith.constant 1 : i32
    %97 = vector.broadcast %c1_i32_39 : i32 to vector<8x256xi32>
    %98 = arith.addi %0, %97 : vector<8x256xi32>
    %c0_i32_40 = arith.constant 0 : i32
    %99 = vector.broadcast %c0_i32_40 : i32 to vector<8x256xi32>
    %100 = arith.cmpi sge, %98, %99 : vector<8x256xi32>
    %c1_i32_41 = arith.constant 1 : i32
    %101 = vector.broadcast %c1_i32_41 : i32 to vector<8x256xi32>
    %102 = arith.addi %0, %101 : vector<8x256xi32>
    %c16_i32_42 = arith.constant 16 : i32
    %103 = vector.broadcast %c16_i32_42 : i32 to vector<8x256xi32>
    %104 = arith.cmpi slt, %102, %103 : vector<8x256xi32>
    %105 = arith.andi %100, %104 : vector<8x256xi1>
    %c-1_i32_43 = arith.constant -1 : i32
    %106 = vector.broadcast %c-1_i32_43 : i32 to vector<8x256xi32>
    %107 = arith.addi %1, %106 : vector<8x256xi32>
    %c0_i32_44 = arith.constant 0 : i32
    %108 = vector.broadcast %c0_i32_44 : i32 to vector<8x256xi32>
    %109 = arith.cmpi sge, %107, %108 : vector<8x256xi32>
    %110 = arith.andi %105, %109 : vector<8x256xi1>
    %c-1_i32_45 = arith.constant -1 : i32
    %111 = vector.broadcast %c-1_i32_45 : i32 to vector<8x256xi32>
    %112 = arith.addi %1, %111 : vector<8x256xi32>
    %c16_i32_46 = arith.constant 16 : i32
    %113 = vector.broadcast %c16_i32_46 : i32 to vector<8x256xi32>
    %114 = arith.cmpi slt, %112, %113 : vector<8x256xi32>
    %115 = arith.andi %110, %114 : vector<8x256xi1>
    %c1_i32_47 = arith.constant 1 : i32
    %116 = vector.broadcast %c1_i32_47 : i32 to vector<8x256xi32>
    %117 = arith.addi %0, %116 : vector<8x256xi32>
    %c0_i32_48 = arith.constant 0 : i32
    %118 = vector.broadcast %c0_i32_48 : i32 to vector<8x256xi32>
    %119 = arith.cmpi sge, %117, %118 : vector<8x256xi32>
    %c1_i32_49 = arith.constant 1 : i32
    %120 = vector.broadcast %c1_i32_49 : i32 to vector<8x256xi32>
    %121 = arith.addi %0, %120 : vector<8x256xi32>
    %c16_i32_50 = arith.constant 16 : i32
    %122 = vector.broadcast %c16_i32_50 : i32 to vector<8x256xi32>
    %123 = arith.cmpi slt, %121, %122 : vector<8x256xi32>
    %124 = arith.andi %119, %123 : vector<8x256xi1>
    %c0_i32_51 = arith.constant 0 : i32
    %125 = vector.broadcast %c0_i32_51 : i32 to vector<8x256xi32>
    %126 = arith.addi %1, %125 : vector<8x256xi32>
    %c0_i32_52 = arith.constant 0 : i32
    %127 = vector.broadcast %c0_i32_52 : i32 to vector<8x256xi32>
    %128 = arith.cmpi sge, %126, %127 : vector<8x256xi32>
    %129 = arith.andi %124, %128 : vector<8x256xi1>
    %c0_i32_53 = arith.constant 0 : i32
    %130 = vector.broadcast %c0_i32_53 : i32 to vector<8x256xi32>
    %131 = arith.addi %1, %130 : vector<8x256xi32>
    %c16_i32_54 = arith.constant 16 : i32
    %132 = vector.broadcast %c16_i32_54 : i32 to vector<8x256xi32>
    %133 = arith.cmpi slt, %131, %132 : vector<8x256xi32>
    %134 = arith.andi %129, %133 : vector<8x256xi1>
    %c1_i32_55 = arith.constant 1 : i32
    %135 = vector.broadcast %c1_i32_55 : i32 to vector<8x256xi32>
    %136 = arith.addi %0, %135 : vector<8x256xi32>
    %c0_i32_56 = arith.constant 0 : i32
    %137 = vector.broadcast %c0_i32_56 : i32 to vector<8x256xi32>
    %138 = arith.cmpi sge, %136, %137 : vector<8x256xi32>
    %c1_i32_57 = arith.constant 1 : i32
    %139 = vector.broadcast %c1_i32_57 : i32 to vector<8x256xi32>
    %140 = arith.addi %0, %139 : vector<8x256xi32>
    %c16_i32_58 = arith.constant 16 : i32
    %141 = vector.broadcast %c16_i32_58 : i32 to vector<8x256xi32>
    %142 = arith.cmpi slt, %140, %141 : vector<8x256xi32>
    %143 = arith.andi %138, %142 : vector<8x256xi1>
    %c1_i32_59 = arith.constant 1 : i32
    %144 = vector.broadcast %c1_i32_59 : i32 to vector<8x256xi32>
    %145 = arith.addi %1, %144 : vector<8x256xi32>
    %c0_i32_60 = arith.constant 0 : i32
    %146 = vector.broadcast %c0_i32_60 : i32 to vector<8x256xi32>
    %147 = arith.cmpi sge, %145, %146 : vector<8x256xi32>
    %148 = arith.andi %143, %147 : vector<8x256xi1>
    %c1_i32_61 = arith.constant 1 : i32
    %149 = vector.broadcast %c1_i32_61 : i32 to vector<8x256xi32>
    %150 = arith.addi %1, %149 : vector<8x256xi32>
    %c16_i32_62 = arith.constant 16 : i32
    %151 = vector.broadcast %c16_i32_62 : i32 to vector<8x256xi32>
    %152 = arith.cmpi slt, %150, %151 : vector<8x256xi32>
    %153 = arith.andi %148, %152 : vector<8x256xi1>
    %c0_63 = arith.constant 0 : index
    %c0_64 = arith.constant 0 : index
    %154 = vector.load %arg0[%c0_63, %c0_64] : memref<8x256xf32, #tpu.memory_space<vmem>>, vector<8x256xf32>
    %c17_i32 = arith.constant 17 : i32
    %155 = tpu.dynamic_rotate %154 by %c17_i32 dim 1 : vector<8x256xf32>, i32 -> vector<8x256xf32>
    %cst = arith.constant 0.000000e+00 : f32
    %156 = vector.broadcast %cst : f32 to vector<8x256xf32>
    %157 = arith.select %20, %155, %156 : vector<8x256xi1>, vector<8x256xf32>
    %c16_i32_65 = arith.constant 16 : i32
    %158 = tpu.dynamic_rotate %154 by %c16_i32_65 dim 1 : vector<8x256xf32>, i32 -> vector<8x256xf32>
    %cst_66 = arith.constant 0.000000e+00 : f32
    %159 = vector.broadcast %cst_66 : f32 to vector<8x256xf32>
    %160 = arith.select %39, %158, %159 : vector<8x256xi1>, vector<8x256xf32>
    %c15_i32 = arith.constant 15 : i32
    %161 = tpu.dynamic_rotate %154 by %c15_i32 dim 1 : vector<8x256xf32>, i32 -> vector<8x256xf32>
    %cst_67 = arith.constant 0.000000e+00 : f32
    %162 = vector.broadcast %cst_67 : f32 to vector<8x256xf32>
    %163 = arith.select %58, %161, %162 : vector<8x256xi1>, vector<8x256xf32>
    %c1_i32_68 = arith.constant 1 : i32
    %164 = tpu.dynamic_rotate %154 by %c1_i32_68 dim 1 : vector<8x256xf32>, i32 -> vector<8x256xf32>
    %cst_69 = arith.constant 0.000000e+00 : f32
    %165 = vector.broadcast %cst_69 : f32 to vector<8x256xf32>
    %166 = arith.select %77, %164, %165 : vector<8x256xi1>, vector<8x256xf32>
    %c255_i32 = arith.constant 255 : i32
    %167 = tpu.dynamic_rotate %154 by %c255_i32 dim 1 : vector<8x256xf32>, i32 -> vector<8x256xf32>
    %cst_70 = arith.constant 0.000000e+00 : f32
    %168 = vector.broadcast %cst_70 : f32 to vector<8x256xf32>
    %169 = arith.select %96, %167, %168 : vector<8x256xi1>, vector<8x256xf32>
    %c241_i32 = arith.constant 241 : i32
    %170 = tpu.dynamic_rotate %154 by %c241_i32 dim 1 : vector<8x256xf32>, i32 -> vector<8x256xf32>
    %cst_71 = arith.constant 0.000000e+00 : f32
    %171 = vector.broadcast %cst_71 : f32 to vector<8x256xf32>
    %172 = arith.select %115, %170, %171 : vector<8x256xi1>, vector<8x256xf32>
    %c240_i32 = arith.constant 240 : i32
    %173 = tpu.dynamic_rotate %154 by %c240_i32 dim 1 : vector<8x256xf32>, i32 -> vector<8x256xf32>
    %cst_72 = arith.constant 0.000000e+00 : f32
    %174 = vector.broadcast %cst_72 : f32 to vector<8x256xf32>
    %175 = arith.select %134, %173, %174 : vector<8x256xi1>, vector<8x256xf32>
    %c239_i32 = arith.constant 239 : i32
    %176 = tpu.dynamic_rotate %154 by %c239_i32 dim 1 : vector<8x256xf32>, i32 -> vector<8x256xf32>
    %cst_73 = arith.constant 0.000000e+00 : f32
    %177 = vector.broadcast %cst_73 : f32 to vector<8x256xf32>
    %178 = arith.select %153, %176, %177 : vector<8x256xi1>, vector<8x256xf32>
    %179 = tpu.concatenate %157, %160, %163, %166, %154, %169, %172, %175, %178 in 0 : vector<8x256xf32>, vector<8x256xf32>, vector<8x256xf32>, vector<8x256xf32>, vector<8x256xf32>, vector<8x256xf32>, vector<8x256xf32>, vector<8x256xf32>, vector<8x256xf32> -> vector<72x256xf32>
    %180 = arith.truncf %179 : vector<72x256xf32> to vector<72x256xbf16>
    %c0_74 = arith.constant 0 : index
    %c0_75 = arith.constant 0 : index
    %181 = vector.load %arg3[%c0_74, %c0_75] : memref<8x72xbf16, #tpu.memory_space<vmem>>, vector<8x72xbf16>
    %cst_76 = arith.constant dense<0.000000e+00> : vector<8x256xf32>
    %182 = tpu.matmul %181, %180, %cst_76 {dimension_numbers = #tpu.dot_dimension_numbers<[1], [0], [0], [1], [0, 0, 1, 1], [], []>} : vector<8x72xbf16>, vector<72x256xbf16>, vector<8x256xf32> -> vector<8x256xf32>
    %c0_77 = arith.constant 0 : index
    %c0_78 = arith.constant 0 : index
    %183 = vector.load %arg4[%c0_77, %c0_78] : memref<8x1xf32, #tpu.memory_space<vmem>>, vector<8x1xf32>
    %184 = vector.broadcast %183 : vector<8x1xf32> to vector<8x256xf32>
    %185 = arith.addf %182, %184 : vector<8x256xf32>
    %cst_79 = arith.constant 0.000000e+00 : f32
    %186 = vector.broadcast %cst_79 : f32 to vector<8x256xf32>
    %187 = arith.maximumf %185, %186 : vector<8x256xf32>
    %c17_i32_80 = arith.constant 17 : i32
    %188 = tpu.dynamic_rotate %187 by %c17_i32_80 dim 1 : vector<8x256xf32>, i32 -> vector<8x256xf32>
    %cst_81 = arith.constant 0.000000e+00 : f32
    %189 = vector.broadcast %cst_81 : f32 to vector<8x256xf32>
    %190 = arith.select %20, %188, %189 : vector<8x256xi1>, vector<8x256xf32>
    %c16_i32_82 = arith.constant 16 : i32
    %191 = tpu.dynamic_rotate %187 by %c16_i32_82 dim 1 : vector<8x256xf32>, i32 -> vector<8x256xf32>
    %cst_83 = arith.constant 0.000000e+00 : f32
    %192 = vector.broadcast %cst_83 : f32 to vector<8x256xf32>
    %193 = arith.select %39, %191, %192 : vector<8x256xi1>, vector<8x256xf32>
    %c15_i32_84 = arith.constant 15 : i32
    %194 = tpu.dynamic_rotate %187 by %c15_i32_84 dim 1 : vector<8x256xf32>, i32 -> vector<8x256xf32>
    %cst_85 = arith.constant 0.000000e+00 : f32
    %195 = vector.broadcast %cst_85 : f32 to vector<8x256xf32>
    %196 = arith.select %58, %194, %195 : vector<8x256xi1>, vector<8x256xf32>
    %c1_i32_86 = arith.constant 1 : i32
    %197 = tpu.dynamic_rotate %187 by %c1_i32_86 dim 1 : vector<8x256xf32>, i32 -> vector<8x256xf32>
    %cst_87 = arith.constant 0.000000e+00 : f32
    %198 = vector.broadcast %cst_87 : f32 to vector<8x256xf32>
    %199 = arith.select %77, %197, %198 : vector<8x256xi1>, vector<8x256xf32>
    %c255_i32_88 = arith.constant 255 : i32
    %200 = tpu.dynamic_rotate %187 by %c255_i32_88 dim 1 : vector<8x256xf32>, i32 -> vector<8x256xf32>
    %cst_89 = arith.constant 0.000000e+00 : f32
    %201 = vector.broadcast %cst_89 : f32 to vector<8x256xf32>
    %202 = arith.select %96, %200, %201 : vector<8x256xi1>, vector<8x256xf32>
    %c241_i32_90 = arith.constant 241 : i32
    %203 = tpu.dynamic_rotate %187 by %c241_i32_90 dim 1 : vector<8x256xf32>, i32 -> vector<8x256xf32>
    %cst_91 = arith.constant 0.000000e+00 : f32
    %204 = vector.broadcast %cst_91 : f32 to vector<8x256xf32>
    %205 = arith.select %115, %203, %204 : vector<8x256xi1>, vector<8x256xf32>
    %c240_i32_92 = arith.constant 240 : i32
    %206 = tpu.dynamic_rotate %187 by %c240_i32_92 dim 1 : vector<8x256xf32>, i32 -> vector<8x256xf32>
    %cst_93 = arith.constant 0.000000e+00 : f32
    %207 = vector.broadcast %cst_93 : f32 to vector<8x256xf32>
    %208 = arith.select %134, %206, %207 : vector<8x256xi1>, vector<8x256xf32>
    %c239_i32_94 = arith.constant 239 : i32
    %209 = tpu.dynamic_rotate %187 by %c239_i32_94 dim 1 : vector<8x256xf32>, i32 -> vector<8x256xf32>
    %cst_95 = arith.constant 0.000000e+00 : f32
    %210 = vector.broadcast %cst_95 : f32 to vector<8x256xf32>
    %211 = arith.select %153, %209, %210 : vector<8x256xi1>, vector<8x256xf32>
    %212 = tpu.concatenate %190, %193, %196, %199, %187, %202, %205, %208, %211 in 0 : vector<8x256xf32>, vector<8x256xf32>, vector<8x256xf32>, vector<8x256xf32>, vector<8x256xf32>, vector<8x256xf32>, vector<8x256xf32>, vector<8x256xf32>, vector<8x256xf32> -> vector<72x256xf32>
    %213 = arith.truncf %212 : vector<72x256xf32> to vector<72x256xbf16>
    %c0_96 = arith.constant 0 : index
    %c0_97 = arith.constant 0 : index
    %214 = vector.load %arg5[%c0_96, %c0_97] : memref<8x72xbf16, #tpu.memory_space<vmem>>, vector<8x72xbf16>
    %cst_98 = arith.constant dense<0.000000e+00> : vector<8x256xf32>
    %215 = tpu.matmul %214, %213, %cst_98 {dimension_numbers = #tpu.dot_dimension_numbers<[1], [0], [0], [1], [0, 0, 1, 1], [], []>} : vector<8x72xbf16>, vector<72x256xbf16>, vector<8x256xf32> -> vector<8x256xf32>
    %c0_99 = arith.constant 0 : index
    %c0_100 = arith.constant 0 : index
    %216 = vector.load %arg6[%c0_99, %c0_100] : memref<8x1xf32, #tpu.memory_space<vmem>>, vector<8x1xf32>
    %217 = vector.broadcast %216 : vector<8x1xf32> to vector<8x256xf32>
    %218 = arith.addf %215, %217 : vector<8x256xf32>
    %cst_101 = arith.constant 0.000000e+00 : f32
    %219 = vector.broadcast %cst_101 : f32 to vector<8x256xf32>
    %220 = arith.maximumf %218, %219 : vector<8x256xf32>
    %c255_i32_102 = arith.constant 255 : i32
    %221 = tpu.dynamic_rotate %220 by %c255_i32_102 dim 1 : vector<8x256xf32>, i32 -> vector<8x256xf32>
    %c254_i32 = arith.constant 254 : i32
    %222 = tpu.dynamic_rotate %220 by %c254_i32 dim 1 : vector<8x256xf32>, i32 -> vector<8x256xf32>
    %223 = arith.maximumf %221, %222 : vector<8x256xf32>
    %224 = arith.maximumf %220, %223 : vector<8x256xf32>
    %c240_i32_103 = arith.constant 240 : i32
    %225 = tpu.dynamic_rotate %224 by %c240_i32_103 dim 1 : vector<8x256xf32>, i32 -> vector<8x256xf32>
    %c224_i32 = arith.constant 224 : i32
    %226 = tpu.dynamic_rotate %224 by %c224_i32 dim 1 : vector<8x256xf32>, i32 -> vector<8x256xf32>
    %227 = arith.maximumf %225, %226 : vector<8x256xf32>
    %228 = arith.maximumf %224, %227 : vector<8x256xf32>
    %c0_104 = arith.constant 0 : index
    %c0_105 = arith.constant 0 : index
    %229 = vector.load %arg13[%c0_104, %c0_105] : memref<8x256xf32, #tpu.memory_space<vmem>>, vector<8x256xf32>
    tpu.vector_store %arg13[%c0_104, %c0_105], %228 {strides = array<i32>} : memref<8x256xf32, #tpu.memory_space<vmem>>, vector<8x256xf32>,
    %c0_106 = arith.constant 0 : index
    %c0_107 = arith.constant 0 : index
    %230 = vector.load %arg13[%c0_106, %c0_107] : memref<8x256xf32, #tpu.memory_space<vmem>>, vector<1x256xf32>
    %c0_108 = arith.constant 0 : index
    %c0_109 = arith.constant 0 : index
    %231 = vector.load %arg14[%c0_108, %c0_109] : memref<1x2048xf32, #tpu.memory_space<vmem>>, vector<1x256xf32>
    tpu.vector_store %arg14[%c0_108, %c0_109], %230 {strides = array<i32>} : memref<1x2048xf32, #tpu.memory_space<vmem>>, vector<1x256xf32>,
    %c1 = arith.constant 1 : index
    %c0_110 = arith.constant 0 : index
    %232 = vector.load %arg13[%c1, %c0_110] : memref<8x256xf32, #tpu.memory_space<vmem>>, vector<1x256xf32>
    %c0_111 = arith.constant 0 : index
    %c256 = arith.constant 256 : index
    %233 = vector.load %arg14[%c0_111, %c256] : memref<1x2048xf32, #tpu.memory_space<vmem>>, vector<1x256xf32>
    tpu.vector_store %arg14[%c0_111, %c256], %232 {strides = array<i32>} : memref<1x2048xf32, #tpu.memory_space<vmem>>, vector<1x256xf32>,
    %c2 = arith.constant 2 : index
    %c0_112 = arith.constant 0 : index
    %234 = vector.load %arg13[%c2, %c0_112] : memref<8x256xf32, #tpu.memory_space<vmem>>, vector<1x256xf32>
    %c0_113 = arith.constant 0 : index
    %c512 = arith.constant 512 : index
    %235 = vector.load %arg14[%c0_113, %c512] : memref<1x2048xf32, #tpu.memory_space<vmem>>, vector<1x256xf32>
    tpu.vector_store %arg14[%c0_113, %c512], %234 {strides = array<i32>} : memref<1x2048xf32, #tpu.memory_space<vmem>>, vector<1x256xf32>,
    %c3 = arith.constant 3 : index
    %c0_114 = arith.constant 0 : index
    %236 = vector.load %arg13[%c3, %c0_114] : memref<8x256xf32, #tpu.memory_space<vmem>>, vector<1x256xf32>
    %c0_115 = arith.constant 0 : index
    %c768 = arith.constant 768 : index
    %237 = vector.load %arg14[%c0_115, %c768] : memref<1x2048xf32, #tpu.memory_space<vmem>>, vector<1x256xf32>
    tpu.vector_store %arg14[%c0_115, %c768], %236 {strides = array<i32>} : memref<1x2048xf32, #tpu.memory_space<vmem>>, vector<1x256xf32>,
    %c4 = arith.constant 4 : index
    %c0_116 = arith.constant 0 : index
    %238 = vector.load %arg13[%c4, %c0_116] : memref<8x256xf32, #tpu.memory_space<vmem>>, vector<1x256xf32>
    %c0_117 = arith.constant 0 : index
    %c1024 = arith.constant 1024 : index
    %239 = vector.load %arg14[%c0_117, %c1024] : memref<1x2048xf32, #tpu.memory_space<vmem>>, vector<1x256xf32>
    tpu.vector_store %arg14[%c0_117, %c1024], %238 {strides = array<i32>} : memref<1x2048xf32, #tpu.memory_space<vmem>>, vector<1x256xf32>,
    %c5 = arith.constant 5 : index
    %c0_118 = arith.constant 0 : index
    %240 = vector.load %arg13[%c5, %c0_118] : memref<8x256xf32, #tpu.memory_space<vmem>>, vector<1x256xf32>
    %c0_119 = arith.constant 0 : index
    %c1280 = arith.constant 1280 : index
    %241 = vector.load %arg14[%c0_119, %c1280] : memref<1x2048xf32, #tpu.memory_space<vmem>>, vector<1x256xf32>
    tpu.vector_store %arg14[%c0_119, %c1280], %240 {strides = array<i32>} : memref<1x2048xf32, #tpu.memory_space<vmem>>, vector<1x256xf32>,
    %c6 = arith.constant 6 : index
    %c0_120 = arith.constant 0 : index
    %242 = vector.load %arg13[%c6, %c0_120] : memref<8x256xf32, #tpu.memory_space<vmem>>, vector<1x256xf32>
    %c0_121 = arith.constant 0 : index
    %c1536 = arith.constant 1536 : index
    %243 = vector.load %arg14[%c0_121, %c1536] : memref<1x2048xf32, #tpu.memory_space<vmem>>, vector<1x256xf32>
    tpu.vector_store %arg14[%c0_121, %c1536], %242 {strides = array<i32>} : memref<1x2048xf32, #tpu.memory_space<vmem>>, vector<1x256xf32>,
    %c7 = arith.constant 7 : index
    %c0_122 = arith.constant 0 : index
    %244 = vector.load %arg13[%c7, %c0_122] : memref<8x256xf32, #tpu.memory_space<vmem>>, vector<1x256xf32>
    %c0_123 = arith.constant 0 : index
    %c1792 = arith.constant 1792 : index
    %245 = vector.load %arg14[%c0_123, %c1792] : memref<1x2048xf32, #tpu.memory_space<vmem>>, vector<1x256xf32>
    tpu.vector_store %arg14[%c0_123, %c1792], %244 {strides = array<i32>} : memref<1x2048xf32, #tpu.memory_space<vmem>>, vector<1x256xf32>,
    tpu.wait_dma2 semaphore(%arg15 : memref<!tpu.dma_semaphore, #tpu.memory_space<semaphore_mem>>) src(%arg7 : memref<2048x32xbf16, #tpu.memory_space<any>>) dst(%arg12 : memref<2048x32xbf16, #tpu.memory_space<vmem>>)
    %c0_124 = arith.constant 0 : index
    %c0_125 = arith.constant 0 : index
    %246 = vector.load %arg14[%c0_124, %c0_125] : memref<1x2048xf32, #tpu.memory_space<vmem>>, vector<1x2048xf32>
    %247 = arith.truncf %246 : vector<1x2048xf32> to vector<1x2048xbf16>
    %c0_126 = arith.constant 0 : index
    %c0_127 = arith.constant 0 : index
    %248 = vector.load %arg12[%c0_126, %c0_127] : memref<2048x32xbf16, #tpu.memory_space<vmem>>, vector<2048x32xbf16>
    %cst_128 = arith.constant dense<0.000000e+00> : vector<1x32xf32>
    %249 = tpu.matmul %247, %248, %cst_128 {dimension_numbers = #tpu.dot_dimension_numbers<[1], [0], [0], [1], [0, 0, 1, 1], [], []>} : vector<1x2048xbf16>, vector<2048x32xbf16>, vector<1x32xf32> -> vector<1x32xf32>
    %c0_129 = arith.constant 0 : index
    %c0_130 = arith.constant 0 : index
    %250 = vector.load %arg8[%c0_129, %c0_130] : memref<1x32xf32, #tpu.memory_space<vmem>>, vector<1x32xf32>
    %251 = arith.addf %249, %250 : vector<1x32xf32>
    %cst_131 = arith.constant 0.000000e+00 : f32
    %252 = vector.broadcast %cst_131 : f32 to vector<1x32xf32>
    %253 = arith.maximumf %251, %252 : vector<1x32xf32>
    %254 = arith.truncf %253 : vector<1x32xf32> to vector<1x32xbf16>
    %c0_132 = arith.constant 0 : index
    %c0_133 = arith.constant 0 : index
    %255 = vector.load %arg9[%c0_132, %c0_133] : memref<32x10xbf16, #tpu.memory_space<vmem>>, vector<32x10xbf16>
    %cst_134 = arith.constant dense<0.000000e+00> : vector<1x10xf32>
    %256 = tpu.matmul %254, %255, %cst_134 {dimension_numbers = #tpu.dot_dimension_numbers<[1], [0], [0], [1], [0, 0, 1, 1], [], []>} : vector<1x32xbf16>, vector<32x10xbf16>, vector<1x10xf32> -> vector<1x10xf32>
    %c0_135 = arith.constant 0 : index
    %c0_136 = arith.constant 0 : index
    %257 = vector.load %arg10[%c0_135, %c0_136] : memref<1x10xf32, #tpu.memory_space<vmem>>, vector<1x10xf32>
    %258 = arith.addf %256, %257 : vector<1x10xf32>
    %c0_137 = arith.constant 0 : index
    %c0_138 = arith.constant 0 : index
    %259 = vector.load %arg11[%c0_137, %c0_138] : memref<1x10xf32, #tpu.memory_space<vmem>>, vector<1x10xf32>
    tpu.vector_store %arg11[%c0_137, %c0_138], %258 {strides = array<i32>} : memref<1x10xf32, #tpu.memory_space<vmem>>, vector<1x10xf32>,
    return
  }
}

</mosaic_0001>

<bundles_post_ra>
// kernel: tpu_custom_call.1
= control target key start
LH: loop header
LB: loop body
LE: loop exit
PB: predicated region body
PF: predicated region fallthrough
CT: control target
= control target key end

     0   :  { %16 = vsyncpa [#allocation7], 0  ;;  %s3986_s0 = inlined_call_operand.vmem [shape: f32[8,256], index: 0, kind: input, shape index: {}]   ;;  %s3987_s1 = inlined_call_operand.vmem [shape: s32[8,256], index: 1, kind: input, shape index: {}]   ;;  %s3988_s2 = inlined_call_operand.vmem [shape: s32[8,256], index: 2, kind: input, shape index: {}]   ;;  %s3989_s3 = inlined_call_operand.vmem [shape: bf16[8,72], index: 3, kind: input, shape index: {}]   ;;  %s3990_s4 = inlined_call_operand.vmem [shape: f32[8,1], index: 4, kind: input, shape index: {}]   ;;  %s3991_s5 = inlined_call_operand.vmem [shape: bf16[8,72], index: 5, kind: input, shape index: {}]   ;;  %s3992_s6 = inlined_call_operand.vmem [shape: f32[8,1], index: 6, kind: input, shape index: {}]   ;;  %s3993_s7 = inlined_call_operand.vmem [shape: bf16[2048,32], index: 7, kind: input, shape index: {}]   ;;  %s3994_s8 = inlined_call_operand.vmem [shape: f32[1,32], index: 8, kind: input, shape index: {}]   ;;  %s3995_s9 = inlined_call_operand.vmem [shape: bf16[32,10], index: 9, kind: input, shape index: {}]   ;;  %s3996_s10 = inlined_call_operand.vmem [shape: f32[1,10], index: 10, kind: input, shape index: {}]   ;;  %s3997_s11 = inlined_call_operand.hbm [shape: f32[1,10], index: 11, kind: output, shape index: {}]  }
   0x1   :  { %v71_v0 = vld [vmem:[%s3993_s7] sm:$0xff]  ;;  %v73_v1 = vld [vmem:[%s3993_s7 + $0x8] sm:$0xff]  ;;  %v75_v2 = vld [vmem:[%s3993_s7 + $0x10] sm:$0xff] }
   0x2   :  { %72 = vst [vmem:[#allocation2] sm:$0xff] %v71_v0  ;;  %74 = vst [vmem:[#allocation2 + $0x8] sm:$0xff] %v73_v1  ;;  %v77_v3 = vld [vmem:[%s3993_s7 + $0x18] sm:$0xff]  ;;  %v79_v4 = vld [vmem:[%s3993_s7 + $0x20] sm:$0xff] }
   0x3   :  { %76 = vst [vmem:[#allocation2 + $0x10] sm:$0xff] %v75_v2  ;;  %78 = vst [vmem:[#allocation2 + $0x18] sm:$0xff] %v77_v3  ;;  %v81_v5 = vld [vmem:[%s3993_s7 + $0x28] sm:$0xff]  ;;  %v83_v6 = vld [vmem:[%s3993_s7 + $0x30] sm:$0xff] }
   0x4   :  { %80 = vst [vmem:[#allocation2 + $0x20] sm:$0xff] %v79_v4  ;;  %v85_v7 = vld [vmem:[%s3993_s7 + $0x38] sm:$0xff]  ;;  %82 = vst [vmem:[#allocation2 + $0x28] sm:$0xff] %v81_v5  ;;  %v87_v8 = vld [vmem:[%s3993_s7 + $0x40] sm:$0xff] }
   0x5   :  { %84 = vst [vmem:[#allocation2 + $0x30] sm:$0xff] %v83_v6  ;;  %86 = vst [vmem:[#allocation2 + $0x38] sm:$0xff] %v85_v7  ;;  %v89_v9 = vld [vmem:[%s3993_s7 + $0x48] sm:$0xff]  ;;  %v91_v10 = vld [vmem:[%s3993_s7 + $0x50] sm:$0xff] }
   0x6   :  { %88 = vst [vmem:[#allocation2 + $0x40] sm:$0xff] %v87_v8  ;;  %90 = vst [vmem:[#allocation2 + $0x48] sm:$0xff] %v89_v9  ;;  %v93_v11 = vld [vmem:[%s3993_s7 + $0x58] sm:$0xff]  ;;  %v95_v12 = vld [vmem:[%s3993_s7 + $0x60] sm:$0xff] }
   0x7   :  { %92 = vst [vmem:[#allocation2 + $0x50] sm:$0xff] %v91_v10  ;;  %v97_v13 = vld [vmem:[%s3993_s7 + $0x68] sm:$0xff]  ;;  %94 = vst [vmem:[#allocation2 + $0x58] sm:$0xff] %v93_v11  ;;  %v99_v14 = vld [vmem:[%s3993_s7 + $0x70] sm:$0xff] }
   0x8   :  { %96 = vst [vmem:[#allocation2 + $0x60] sm:$0xff] %v95_v12  ;;  %98 = vst [vmem:[#allocation2 + $0x68] sm:$0xff] %v97_v13  ;;  %v101_v15 = vld [vmem:[%s3993_s7 + $0x78] sm:$0xff]  ;;  %v103_v16 = vld [vmem:[%s3993_s7 + $0x80] sm:$0xff] }
   0x9   :  { %100 = vst [vmem:[#allocation2 + $0x70] sm:$0xff] %v99_v14  ;;  %102 = vst [vmem:[#allocation2 + $0x78] sm:$0xff] %v101_v15  ;;  %v105_v17 = vld [vmem:[%s3993_s7 + $0x88] sm:$0xff]  ;;  %v107_v18 = vld [vmem:[%s3993_s7 + $0x90] sm:$0xff] }
   0xa   :  { %104 = vst [vmem:[#allocation2 + $0x80] sm:$0xff] %v103_v16  ;;  %v109_v19 = vld [vmem:[%s3993_s7 + $0x98] sm:$0xff]  ;;  %106 = vst [vmem:[#allocation2 + $0x88] sm:$0xff] %v105_v17  ;;  %v111_v20 = vld [vmem:[%s3993_s7 + $0xa0] sm:$0xff] }
   0xb   :  { %108 = vst [vmem:[#allocation2 + $0x90] sm:$0xff] %v107_v18  ;;  %110 = vst [vmem:[#allocation2 + $0x98] sm:$0xff] %v109_v19  ;;  %v113_v21 = vld [vmem:[%s3993_s7 + $0xa8] sm:$0xff]  ;;  %v115_v22 = vld [vmem:[%s3993_s7 + $0xb0] sm:$0xff] }
   0xc   :  { %112 = vst [vmem:[#allocation2 + $0xa0] sm:$0xff] %v111_v20  ;;  %114 = vst [vmem:[#allocation2 + $0xa8] sm:$0xff] %v113_v21  ;;  %v117_v23 = vld [vmem:[%s3993_s7 + $0xb8] sm:$0xff]  ;;  %v119_v24 = vld [vmem:[%s3993_s7 + $0xc0] sm:$0xff] }
   0xd   :  { %116 = vst [vmem:[#allocation2 + $0xb0] sm:$0xff] %v115_v22  ;;  %v121_v25 = vld [vmem:[%s3993_s7 + $0xc8] sm:$0xff]  ;;  %118 = vst [vmem:[#allocation2 + $0xb8] sm:$0xff] %v117_v23  ;;  %v123_v26 = vld [vmem:[%s3993_s7 + $0xd0] sm:$0xff] }
   0xe   :  { %120 = vst [vmem:[#allocation2 + $0xc0] sm:$0xff] %v119_v24  ;;  %122 = vst [vmem:[#allocation2 + $0xc8] sm:$0xff] %v121_v25  ;;  %v125_v27 = vld [vmem:[%s3993_s7 + $0xd8] sm:$0xff]  ;;  %v127_v28 = vld [vmem:[%s3993_s7 + $0xe0] sm:$0xff] }
   0xf   :  { %124 = vst [vmem:[#allocation2 + $0xd0] sm:$0xff] %v123_v26  ;;  %126 = vst [vmem:[#allocation2 + $0xd8] sm:$0xff] %v125_v27  ;;  %v129_v29 = vld [vmem:[%s3993_s7 + $0xe8] sm:$0xff]  ;;  %v131_v30 = vld [vmem:[%s3993_s7 + $0xf0] sm:$0xff] }
  0x10   :  { %128 = vst [vmem:[#allocation2 + $0xe0] sm:$0xff] %v127_v28  ;;  %v133_v31 = vld [vmem:[%s3993_s7 + $0xf8] sm:$0xff]  ;;  %130 = vst [vmem:[#allocation2 + $0xe8] sm:$0xff] %v129_v29  ;;  %v135_v32 = vld [vmem:[%s3993_s7 + $0x100] sm:$0xff] }
  0x11   :  { %132 = vst [vmem:[#allocation2 + $0xf0] sm:$0xff] %v131_v30  ;;  %134 = vst [vmem:[#allocation2 + $0xf8] sm:$0xff] %v133_v31  ;;  %v137_v33 = vld [vmem:[%s3993_s7 + $0x108] sm:$0xff]  ;;  %v139_v34 = vld [vmem:[%s3993_s7 + $0x110] sm:$0xff] }
  0x12   :  { %136 = vst [vmem:[#allocation2 + $0x100] sm:$0xff] %v135_v32  ;;  %138 = vst [vmem:[#allocation2 + $0x108] sm:$0xff] %v137_v33  ;;  %v141_v35 = vld [vmem:[%s3993_s7 + $0x118] sm:$0xff]  ;;  %v143_v36 = vld [vmem:[%s3993_s7 + $0x120] sm:$0xff] }
  0x13   :  { %140 = vst [vmem:[#allocation2 + $0x110] sm:$0xff] %v139_v34  ;;  %v145_v37 = vld [vmem:[%s3993_s7 + $0x128] sm:$0xff]  ;;  %142 = vst [vmem:[#allocation2 + $0x118] sm:$0xff] %v141_v35  ;;  %v147_v38 = vld [vmem:[%s3993_s7 + $0x130] sm:$0xff] }
  0x14   :  { %144 = vst [vmem:[#allocation2 + $0x120] sm:$0xff] %v143_v36  ;;  %146 = vst [vmem:[#allocation2 + $0x128] sm:$0xff] %v145_v37  ;;  %v149_v39 = vld [vmem:[%s3993_s7 + $0x138] sm:$0xff]  ;;  %v151_v40 = vld [vmem:[%s3993_s7 + $0x140] sm:$0xff] }
  0x15   :  { %148 = vst [vmem:[#allocation2 + $0x130] sm:$0xff] %v147_v38  ;;  %150 = vst [vmem:[#allocation2 + $0x138] sm:$0xff] %v149_v39  ;;  %v153_v41 = vld [vmem:[%s3993_s7 + $0x148] sm:$0xff]  ;;  %v155_v42 = vld [vmem:[%s3993_s7 + $0x150] sm:$0xff] }
  0x16   :  { %152 = vst [vmem:[#allocation2 + $0x140] sm:$0xff] %v151_v40  ;;  %v157_v43 = vld [vmem:[%s3993_s7 + $0x158] sm:$0xff]  ;;  %154 = vst [vmem:[#allocation2 + $0x148] sm:$0xff] %v153_v41  ;;  %v159_v44 = vld [vmem:[%s3993_s7 + $0x160] sm:$0xff] }
  0x17   :  { %156 = vst [vmem:[#allocation2 + $0x150] sm:$0xff] %v155_v42  ;;  %158 = vst [vmem:[#allocation2 + $0x158] sm:$0xff] %v157_v43  ;;  %v161_v45 = vld [vmem:[%s3993_s7 + $0x168] sm:$0xff]  ;;  %v163_v46 = vld [vmem:[%s3993_s7 + $0x170] sm:$0xff] }
  0x18   :  { %160 = vst [vmem:[#allocation2 + $0x160] sm:$0xff] %v159_v44  ;;  %162 = vst [vmem:[#allocation2 + $0x168] sm:$0xff] %v161_v45  ;;  %v165_v47 = vld [vmem:[%s3993_s7 + $0x178] sm:$0xff]  ;;  %v167_v48 = vld [vmem:[%s3993_s7 + $0x180] sm:$0xff] }
  0x19   :  { %164 = vst [vmem:[#allocation2 + $0x170] sm:$0xff] %v163_v46  ;;  %v169_v49 = vld [vmem:[%s3993_s7 + $0x188] sm:$0xff]  ;;  %166 = vst [vmem:[#allocation2 + $0x178] sm:$0xff] %v165_v47  ;;  %v171_v50 = vld [vmem:[%s3993_s7 + $0x190] sm:$0xff] }
  0x1a   :  { %168 = vst [vmem:[#allocation2 + $0x180] sm:$0xff] %v167_v48  ;;  %170 = vst [vmem:[#allocation2 + $0x188] sm:$0xff] %v169_v49  ;;  %v173_v51 = vld [vmem:[%s3993_s7 + $0x198] sm:$0xff]  ;;  %v175_v52 = vld [vmem:[%s3993_s7 + $0x1a0] sm:$0xff] }
  0x1b   :  { %172 = vst [vmem:[#allocation2 + $0x190] sm:$0xff] %v171_v50  ;;  %174 = vst [vmem:[#allocation2 + $0x198] sm:$0xff] %v173_v51  ;;  %v177_v53 = vld [vmem:[%s3993_s7 + $0x1a8] sm:$0xff]  ;;  %v179_v54 = vld [vmem:[%s3993_s7 + $0x1b0] sm:$0xff] }
  0x1c   :  { %176 = vst [vmem:[#allocation2 + $0x1a0] sm:$0xff] %v175_v52  ;;  %v181_v55 = vld [vmem:[%s3993_s7 + $0x1b8] sm:$0xff]  ;;  %178 = vst [vmem:[#allocation2 + $0x1a8] sm:$0xff] %v177_v53  ;;  %v183_v56 = vld [vmem:[%s3993_s7 + $0x1c0] sm:$0xff] }
  0x1d   :  { %180 = vst [vmem:[#allocation2 + $0x1b0] sm:$0xff] %v179_v54  ;;  %182 = vst [vmem:[#allocation2 + $0x1b8] sm:$0xff] %v181_v55  ;;  %v185_v57 = vld [vmem:[%s3993_s7 + $0x1c8] sm:$0xff]  ;;  %v187_v58 = vld [vmem:[%s3993_s7 + $0x1d0] sm:$0xff] }
  0x1e   :  { %184 = vst [vmem:[#allocation2 + $0x1c0] sm:$0xff] %v183_v56  ;;  %186 = vst [vmem:[#allocation2 + $0x1c8] sm:$0xff] %v185_v57  ;;  %v189_v59 = vld [vmem:[%s3993_s7 + $0x1d8] sm:$0xff]  ;;  %v191_v60 = vld [vmem:[%s3993_s7 + $0x1e0] sm:$0xff] }
  0x1f   :  { %188 = vst [vmem:[#allocation2 + $0x1d0] sm:$0xff] %v187_v58  ;;  %v193_v61 = vld [vmem:[%s3993_s7 + $0x1e8] sm:$0xff]  ;;  %190 = vst [vmem:[#allocation2 + $0x1d8] sm:$0xff] %v189_v59  ;;  %v195_v62 = vld [vmem:[%s3993_s7 + $0x1f0] sm:$0xff] }
  0x20   :  { %192 = vst [vmem:[#allocation2 + $0x1e0] sm:$0xff] %v191_v60  ;;  %194 = vst [vmem:[#allocation2 + $0x1e8] sm:$0xff] %v193_v61  ;;  %v197_v63 = vld [vmem:[%s3993_s7 + $0x1f8] sm:$0xff]  ;;  %v199_v0 = vld [vmem:[%s3993_s7 + $0x200] sm:$0xff] }
  0x21   :  { %196 = vst [vmem:[#allocation2 + $0x1f0] sm:$0xff] %v195_v62  ;;  %198 = vst [vmem:[#allocation2 + $0x1f8] sm:$0xff] %v197_v63  ;;  %v201_v1 = vld [vmem:[%s3993_s7 + $0x208] sm:$0xff]  ;;  %v203_v2 = vld [vmem:[%s3993_s7 + $0x210] sm:$0xff] }
  0x22   :  { %200 = vst [vmem:[#allocation2 + $0x200] sm:$0xff] %v199_v0  ;;  %v205_v3 = vld [vmem:[%s3993_s7 + $0x218] sm:$0xff]  ;;  %202 = vst [vmem:[#allocation2 + $0x208] sm:$0xff] %v201_v1  ;;  %v207_v4 = vld [vmem:[%s3993_s7 + $0x220] sm:$0xff] }
  0x23   :  { %204 = vst [vmem:[#allocation2 + $0x210] sm:$0xff] %v203_v2  ;;  %206 = vst [vmem:[#allocation2 + $0x218] sm:$0xff] %v205_v3  ;;  %v209_v5 = vld [vmem:[%s3993_s7 + $0x228] sm:$0xff]  ;;  %v211_v6 = vld [vmem:[%s3993_s7 + $0x230] sm:$0xff] }
  0x24   :  { %208 = vst [vmem:[#allocation2 + $0x220] sm:$0xff] %v207_v4  ;;  %210 = vst [vmem:[#allocation2 + $0x228] sm:$0xff] %v209_v5  ;;  %v213_v7 = vld [vmem:[%s3993_s7 + $0x238] sm:$0xff]  ;;  %v215_v8 = vld [vmem:[%s3993_s7 + $0x240] sm:$0xff] }
  0x25   :  { %212 = vst [vmem:[#allocation2 + $0x230] sm:$0xff] %v211_v6  ;;  %v217_v9 = vld [vmem:[%s3993_s7 + $0x248] sm:$0xff]  ;;  %214 = vst [vmem:[#allocation2 + $0x238] sm:$0xff] %v213_v7  ;;  %v219_v10 = vld [vmem:[%s3993_s7 + $0x250] sm:$0xff] }
  0x26   :  { %216 = vst [vmem:[#allocation2 + $0x240] sm:$0xff] %v215_v8  ;;  %218 = vst [vmem:[#allocation2 + $0x248] sm:$0xff] %v217_v9  ;;  %v221_v11 = vld [vmem:[%s3993_s7 + $0x258] sm:$0xff]  ;;  %v223_v12 = vld [vmem:[%s3993_s7 + $0x260] sm:$0xff] }
  0x27   :  { %220 = vst [vmem:[#allocation2 + $0x250] sm:$0xff] %v219_v10  ;;  %222 = vst [vmem:[#allocation2 + $0x258] sm:$0xff] %v221_v11  ;;  %v225_v13 = vld [vmem:[%s3993_s7 + $0x268] sm:$0xff]  ;;  %v227_v14 = vld [vmem:[%s3993_s7 + $0x270] sm:$0xff] }
  0x28   :  { %224 = vst [vmem:[#allocation2 + $0x260] sm:$0xff] %v223_v12  ;;  %v229_v15 = vld [vmem:[%s3993_s7 + $0x278] sm:$0xff]  ;;  %226 = vst [vmem:[#allocation2 + $0x268] sm:$0xff] %v225_v13  ;;  %v231_v16 = vld [vmem:[%s3993_s7 + $0x280] sm:$0xff] }
  0x29   :  { %228 = vst [vmem:[#allocation2 + $0x270] sm:$0xff] %v227_v14  ;;  %230 = vst [vmem:[#allocation2 + $0x278] sm:$0xff] %v229_v15  ;;  %v233_v17 = vld [vmem:[%s3993_s7 + $0x288] sm:$0xff]  ;;  %v235_v18 = vld [vmem:[%s3993_s7 + $0x290] sm:$0xff] }
  0x2a   :  { %232 = vst [vmem:[#allocation2 + $0x280] sm:$0xff] %v231_v16  ;;  %234 = vst [vmem:[#allocation2 + $0x288] sm:$0xff] %v233_v17  ;;  %v237_v19 = vld [vmem:[%s3993_s7 + $0x298] sm:$0xff]  ;;  %v239_v20 = vld [vmem:[%s3993_s7 + $0x2a0] sm:$0xff] }
  0x2b   :  { %236 = vst [vmem:[#allocation2 + $0x290] sm:$0xff] %v235_v18  ;;  %v241_v21 = vld [vmem:[%s3993_s7 + $0x2a8] sm:$0xff]  ;;  %238 = vst [vmem:[#allocation2 + $0x298] sm:$0xff] %v237_v19  ;;  %v243_v22 = vld [vmem:[%s3993_s7 + $0x2b0] sm:$0xff] }
  0x2c   :  { %240 = vst [vmem:[#allocation2 + $0x2a0] sm:$0xff] %v239_v20  ;;  %242 = vst [vmem:[#allocation2 + $0x2a8] sm:$0xff] %v241_v21  ;;  %v245_v23 = vld [vmem:[%s3993_s7 + $0x2b8] sm:$0xff]  ;;  %v247_v24 = vld [vmem:[%s3993_s7 + $0x2c0] sm:$0xff] }
  0x2d   :  { %244 = vst [vmem:[#allocation2 + $0x2b0] sm:$0xff] %v243_v22  ;;  %246 = vst [vmem:[#allocation2 + $0x2b8] sm:$0xff] %v245_v23  ;;  %v249_v25 = vld [vmem:[%s3993_s7 + $0x2c8] sm:$0xff]  ;;  %v251_v26 = vld [vmem:[%s3993_s7 + $0x2d0] sm:$0xff] }
  0x2e   :  { %248 = vst [vmem:[#allocation2 + $0x2c0] sm:$0xff] %v247_v24  ;;  %v253_v27 = vld [vmem:[%s3993_s7 + $0x2d8] sm:$0xff]  ;;  %250 = vst [vmem:[#allocation2 + $0x2c8] sm:$0xff] %v249_v25  ;;  %v255_v28 = vld [vmem:[%s3993_s7 + $0x2e0] sm:$0xff] }
  0x2f   :  { %252 = vst [vmem:[#allocation2 + $0x2d0] sm:$0xff] %v251_v26  ;;  %254 = vst [vmem:[#allocation2 + $0x2d8] sm:$0xff] %v253_v27  ;;  %v257_v29 = vld [vmem:[%s3993_s7 + $0x2e8] sm:$0xff]  ;;  %v259_v30 = vld [vmem:[%s3993_s7 + $0x2f0] sm:$0xff] }
  0x30   :  { %256 = vst [vmem:[#allocation2 + $0x2e0] sm:$0xff] %v255_v28  ;;  %258 = vst [vmem:[#allocation2 + $0x2e8] sm:$0xff] %v257_v29  ;;  %v261_v31 = vld [vmem:[%s3993_s7 + $0x2f8] sm:$0xff]  ;;  %v263_v32 = vld [vmem:[%s3993_s7 + $0x300] sm:$0xff] }
  0x31   :  { %260 = vst [vmem:[#allocation2 + $0x2f0] sm:$0xff] %v259_v30  ;;  %v265_v33 = vld [vmem:[%s3993_s7 + $0x308] sm:$0xff]  ;;  %262 = vst [vmem:[#allocation2 + $0x2f8] sm:$0xff] %v261_v31  ;;  %v267_v34 = vld [vmem:[%s3993_s7 + $0x310] sm:$0xff] }
  0x32   :  { %264 = vst [vmem:[#allocation2 + $0x300] sm:$0xff] %v263_v32  ;;  %266 = vst [vmem:[#allocation2 + $0x308] sm:$0xff] %v265_v33  ;;  %v269_v35 = vld [vmem:[%s3993_s7 + $0x318] sm:$0xff]  ;;  %v271_v36 = vld [vmem:[%s3993_s7 + $0x320] sm:$0xff] }
  0x33   :  { %268 = vst [vmem:[#allocation2 + $0x310] sm:$0xff] %v267_v34  ;;  %270 = vst [vmem:[#allocation2 + $0x318] sm:$0xff] %v269_v35  ;;  %v273_v37 = vld [vmem:[%s3993_s7 + $0x328] sm:$0xff]  ;;  %v275_v38 = vld [vmem:[%s3993_s7 + $0x330] sm:$0xff] }
  0x34   :  { %272 = vst [vmem:[#allocation2 + $0x320] sm:$0xff] %v271_v36  ;;  %v277_v39 = vld [vmem:[%s3993_s7 + $0x338] sm:$0xff]  ;;  %274 = vst [vmem:[#allocation2 + $0x328] sm:$0xff] %v273_v37  ;;  %v279_v40 = vld [vmem:[%s3993_s7 + $0x340] sm:$0xff] }
  0x35   :  { %276 = vst [vmem:[#allocation2 + $0x330] sm:$0xff] %v275_v38  ;;  %278 = vst [vmem:[#allocation2 + $0x338] sm:$0xff] %v277_v39  ;;  %v281_v41 = vld [vmem:[%s3993_s7 + $0x348] sm:$0xff]  ;;  %v283_v42 = vld [vmem:[%s3993_s7 + $0x350] sm:$0xff] }
  0x36   :  { %280 = vst [vmem:[#allocation2 + $0x340] sm:$0xff] %v279_v40  ;;  %282 = vst [vmem:[#allocation2 + $0x348] sm:$0xff] %v281_v41  ;;  %v285_v43 = vld [vmem:[%s3993_s7 + $0x358] sm:$0xff]  ;;  %v287_v44 = vld [vmem:[%s3993_s7 + $0x360] sm:$0xff] }
  0x37   :  { %284 = vst [vmem:[#allocation2 + $0x350] sm:$0xff] %v283_v42  ;;  %v289_v45 = vld [vmem:[%s3993_s7 + $0x368] sm:$0xff]  ;;  %286 = vst [vmem:[#allocation2 + $0x358] sm:$0xff] %v285_v43  ;;  %v291_v46 = vld [vmem:[%s3993_s7 + $0x370] sm:$0xff] }
  0x38   :  { %288 = vst [vmem:[#allocation2 + $0x360] sm:$0xff] %v287_v44  ;;  %290 = vst [vmem:[#allocation2 + $0x368] sm:$0xff] %v289_v45  ;;  %v293_v47 = vld [vmem:[%s3993_s7 + $0x378] sm:$0xff]  ;;  %v295_v48 = vld [vmem:[%s3993_s7 + $0x380] sm:$0xff] }
  0x39   :  { %292 = vst [vmem:[#allocation2 + $0x370] sm:$0xff] %v291_v46  ;;  %294 = vst [vmem:[#allocation2 + $0x378] sm:$0xff] %v293_v47  ;;  %v297_v49 = vld [vmem:[%s3993_s7 + $0x388] sm:$0xff]  ;;  %v299_v50 = vld [vmem:[%s3993_s7 + $0x390] sm:$0xff] }
  0x3a   :  { %296 = vst [vmem:[#allocation2 + $0x380] sm:$0xff] %v295_v48  ;;  %v301_v51 = vld [vmem:[%s3993_s7 + $0x398] sm:$0xff]  ;;  %298 = vst [vmem:[#allocation2 + $0x388] sm:$0xff] %v297_v49  ;;  %v303_v52 = vld [vmem:[%s3993_s7 + $0x3a0] sm:$0xff] }
  0x3b   :  { %300 = vst [vmem:[#allocation2 + $0x390] sm:$0xff] %v299_v50  ;;  %302 = vst [vmem:[#allocation2 + $0x398] sm:$0xff] %v301_v51  ;;  %v305_v53 = vld [vmem:[%s3993_s7 + $0x3a8] sm:$0xff]  ;;  %v307_v54 = vld [vmem:[%s3993_s7 + $0x3b0] sm:$0xff] }
  0x3c   :  { %304 = vst [vmem:[#allocation2 + $0x3a0] sm:$0xff] %v303_v52  ;;  %306 = vst [vmem:[#allocation2 + $0x3a8] sm:$0xff] %v305_v53  ;;  %v309_v55 = vld [vmem:[%s3993_s7 + $0x3b8] sm:$0xff]  ;;  %v311_v56 = vld [vmem:[%s3993_s7 + $0x3c0] sm:$0xff] }
  0x3d   :  { %308 = vst [vmem:[#allocation2 + $0x3b0] sm:$0xff] %v307_v54  ;;  %v313_v57 = vld [vmem:[%s3993_s7 + $0x3c8] sm:$0xff]  ;;  %310 = vst [vmem:[#allocation2 + $0x3b8] sm:$0xff] %v309_v55  ;;  %v315_v58 = vld [vmem:[%s3993_s7 + $0x3d0] sm:$0xff] }
  0x3e   :  { %312 = vst [vmem:[#allocation2 + $0x3c0] sm:$0xff] %v311_v56  ;;  %314 = vst [vmem:[#allocation2 + $0x3c8] sm:$0xff] %v313_v57  ;;  %v317_v59 = vld [vmem:[%s3993_s7 + $0x3d8] sm:$0xff]  ;;  %v319_v60 = vld [vmem:[%s3993_s7 + $0x3e0] sm:$0xff] }
  0x3f   :  { %316 = vst [vmem:[#allocation2 + $0x3d0] sm:$0xff] %v315_v58  ;;  %318 = vst [vmem:[#allocation2 + $0x3d8] sm:$0xff] %v317_v59  ;;  %v321_v61 = vld [vmem:[%s3993_s7 + $0x3e8] sm:$0xff]  ;;  %v323_v62 = vld [vmem:[%s3993_s7 + $0x3f0] sm:$0xff] }
  0x40   :  { %320 = vst [vmem:[#allocation2 + $0x3e0] sm:$0xff] %v319_v60  ;;  %v325_v63 = vld [vmem:[%s3993_s7 + $0x3f8] sm:$0xff]  ;;  %322 = vst [vmem:[#allocation2 + $0x3e8] sm:$0xff] %v321_v61  ;;  %v3377_v0 = vld [vmem:[%s3986_s0] sm:$0xff] }
  0x41   :  { %324 = vst [vmem:[#allocation2 + $0x3f0] sm:$0xff] %v323_v62  ;;  %326 = vst [vmem:[#allocation2 + $0x3f8] sm:$0xff] %v325_v63  ;;  %v3382_v1 = vld [vmem:[%s3986_s0 + $0x8] sm:$0xff] }
  0x42   :  { %334 = vsyncadd [#allocation5], 16384  ;;  %v2680_v2 = vpack.i.bf16 %v3382_v1, %v3377_v0  ;;  %s2915_s30 = smov 111   ;;  %s2916_s7 = smov 112   ;;  %v2921_v3 = vmov 0   ;;  %v496_v4 = vld [vmem:[%s3990_s4] sm:$0xff]  ;;  %v415_v23 = vlaneseq }
  0x43   :  { %s2917_s12 = smov 113   ;;  %s2918_s13 = smov 127   ;;  %545 = vmatprep.mubr.bf16.mxu0 %v2921_v3  ;;  %2720 = vset.pattern.permute.xlu0 %v2921_v3  ;;  %v336_v5 = vld [vmem:[%s3987_s1 + $0x8] sm:$0xff]  ;;  %v335_v6 = vld [vmem:[%s3987_s1] sm:$0xff]  ;;  %v4028_v18 = vmov 0  ;;  %v4030_v19 = vmov 0 }
  0x44   :  { %2681 = vrot.lane.b32.xlu0 %v2680_v2, %s2915_s30  ;;  %2691 = vrot.lane.b32.xlu1 %v2680_v2, %s2916_s7  ;;  %s2919_s14 = smov 1   ;;  %s2920_s0 = smov 15   ;;  %v3406_v7 = vld [vmem:[%s3988_s2 + $0x8] sm:$0xff]  ;;  %v390_v8 = vadd.s32 1, %v336_v5  ;;  %v3411_v9 = vld [vmem:[%s3988_s2] sm:$0xff]  ;;  %v389_v10 = vadd.s32 1, %v335_v6 }
  0x45   :  { %s2922_s15 = smov 16   ;;  %s2923_s16 = smov 17   ;;  %678 = vmatprep.mubr.bf16.mxu1 %v2921_v3  ;;  %v3414_v11 = vadd.s32 1, %v3406_v7  ;;  %v3417_v12 = vadd.s32 1, %v3411_v9  ;;  %v3420_v13 = vadd.s32 4294967295, %v3406_v7  ;;  %v3424_v14 = vadd.s32 4294967295, %v3411_v9 }
  0x46   :  { %vm392_vm0 = vcmp.ge.s32.totalorder %v390_v8, 0  ;;  %vm394_vm1 = vcmp.lt.s32.totalorder %v390_v8, 16  ;;  %vm391_vm2 = vcmp.ge.s32.totalorder %v389_v10, 0  ;;  %vm393_vm3 = vcmp.lt.s32.totalorder %v389_v10, 16  ;;  %v630_v3 = vld [vmem:[%s3991_s5] sm:$0xf] }
  0x47   :  { %vm4000_vm4 = vcmp.ge.s32.totalorder %v3414_v11, 0  ;;  %vm396_vm5 = vmand %vm392_vm0, %vm394_vm1  ;;  %vm3998_vm6 = vcmp.ge.s32.totalorder %v3417_v12, 0  ;;  %vm3999_vm8 = vcmp.ge.s32.totalorder %v3420_v13, 0  ;;  %vm4001_vm10 = vcmp.ge.s32.totalorder %v3406_v7, 0  ;;  %s2925_s28 = smov 126   ;;  %s2926_s5 = smov 96  }
  0x48   :  { %2686 = vrot.lane.b32.xlu0 %v2680_v2, %s2917_s12  ;;  %2696 = vrot.lane.b32.xlu1 %v2680_v2, %s2918_s13  ;;  %vm3427_vm7 = vmand %vm391_vm2, %vm393_vm3  ;;  %vm4002_vm12 = vcmp.ge.s32.totalorder %v3424_v14, 0  ;;  %vm4003_vm13 = vcmp.lt.s32.totalorder %v3420_v13, 16  ;;  %vm4005_vm15 = vcmp.lt.s32.totalorder %v3406_v7, 16  ;;  %vm377_vm2 = vcmp.lt.s32.totalorder %v335_v6, 16 }
  0x49   :  { %vm3434_vm9 = vmand %vm396_vm5, %vm4000_vm4  ;;  %vm378_vm4 = vcmp.lt.s32.totalorder %v336_v5, 16  ;;  %v340_v20 = vadd.s32 4294967295, %v336_v5  ;;  %v4033_v21 = vmov 0  ;;  %v4038_v24 = vmov 0 }
  0x4a   :  { %vm3443_vm11 = vmand %vm3427_vm7, %vm3998_vm6  ;;  %v4041_v25 = vmov 0  ;;  %v4043_v26 = vmov 0  ;;  %v4046_v27 = vmov 0  ;;  %v339_v28 = vadd.s32 4294967295, %v335_v6 }
  0x4b   :  { %vm398_vm14 = vmand %vm396_vm5, %vm3999_vm8  ;;  %vm376_vm8 = vcmp.ge.s32.totalorder %v336_v5, 0  ;;  %v3524_v29 = vand.u32 127, %v415_v23  ;;  %v4055_v32 = vmov 0  ;;  %v4065_v41 = vmov 0 }
  0x4c   :  { %2706 = vrot.lane.b32.xlu1 %v2680_v2, %s2919_s14  ;;  %2701 = vrot.lane.b32.xlu0 %v2680_v2, %s2920_s0  ;;  %vm402_vm0 = vmand %vm396_vm5, %vm4001_vm10  ;;  %vm375_vm10 = vcmp.ge.s32.totalorder %v335_v6, 0  ;;  %v4067_v42 = vmov 0  ;;  %v4086_v58 = vmov 0 }
  0x4d   :  { %vm397_vm3 = vmand %vm3427_vm7, %vm4002_vm12  ;;  %vm4010_vm12 = vcmp.lt.s32.totalorder %v3417_v12, 16 }
  0x4e   :  { %vm3462_vm6 = vmand %vm398_vm14, %vm4003_vm13  ;;  %vm4032_vm13 = vcmp.lt.s32.totalorder %v3424_v14, 16  ;;  %vm4040_vm14 = vcmp.lt.s32.totalorder %v3414_v11, 16 }
  0x4f   :  { %v4029_v18 = vsel %vm3462_vm6, 4294967295, %v4028_v18  ;;  %vm3468_vm5 = vmand %vm402_vm0, %vm4005_vm15  ;;  %vm4035_vm0 = vcmp.ge.s32.totalorder %v3411_v9, 0 }
  0x50   :  { %2716 = vrot.lane.b32.xlu1 %v2680_v2, %s2922_s15  ;;  %2711 = vrot.lane.b32.xlu0 %v2680_v2, %s2923_s16  ;;  %v4031_v19 = vsel %vm3468_vm5, 4294967295, %v4030_v19  ;;  %vm3477_vm6 = vmand %vm397_vm3, %vm4032_vm13 }
  0x51   :  { %v4034_v21 = vsel %vm3477_vm6, 4294967295, %v4033_v21  ;;  %vm401_vm15 = vmand %vm3427_vm7, %vm4035_vm0  ;;  %vm4045_vm7 = vcmp.lt.s32.totalorder %v3411_v9, 16  ;;  %vm4052_vm0 = vcmp.lt.s32.totalorder %v3414_v11, 16 }
  0x52   :  { %vm3485_vm5 = vmand %vm376_vm8, %vm378_vm4 }
  0x53   :  { %vm3489_vm1 = vmand %vm375_vm10, %vm377_vm2  ;;  %vm342_vm10 = vcmp.ge.s32.totalorder %v340_v20, 0  ;;  %vm344_vm2 = vcmp.lt.s32.totalorder %v340_v20, 16 }
  0x54   :  { %499 = vperm.xlu0 %2720, %v496_v4   ;;  %v4039_v24 = vsel %vm3489_vm1, 4294967295, %v4038_v24  ;;  %vm3497_vm13 = vmand %vm3434_vm9, %vm4040_vm14  ;;  %vm4048_vm9 = vcmp.ge.s32.totalorder %v3414_v11, 0  ;;  %vm4049_vm14 = vcmp.ge.s32.totalorder %v3417_v12, 0 }
  0x55   :  { %v4042_v25 = vsel %vm3497_vm13, 4294967295, %v4041_v25  ;;  %vm3505_vm4 = vmand %vm3443_vm11, %vm4010_vm12  ;;  %vm4059_vm13 = vcmp.ge.s32.totalorder %v3414_v11, 0 }
  0x56   :  { %v4044_v26 = vsel %vm3505_vm4, 4294967295, %v4043_v26  ;;  %vm3511_vm8 = vmand %vm401_vm15, %vm4045_vm7 }
  0x57   :  { %v4047_v27 = vsel %vm3511_vm8, 4294967295, %v4046_v27  ;;  %vm386_vm3 = vmand %vm3485_vm5, %vm4048_vm9 }
  0x58   :  { %vm385_vm11 = vmand %vm3489_vm1, %vm4049_vm14  ;;  %vm341_vm14 = vcmp.ge.s32.totalorder %v339_v28, 0  ;;  %vm343_vm1 = vcmp.lt.s32.totalorder %v339_v28, 16 }
  0x59   :  { %vm3526_vm15 = vmand %vm342_vm10, %vm344_vm2  ;;  %vm4058_vm10 = vnez %v4031_v19 }
  0x5a   :  { %vm3532_vm7 = vmand %vm386_vm3, %vm4052_vm0  ;;  %vm4011_vm0 = vmmov 1  }
  0x5b   :  { %vm3538_vm9 = vmand %vm385_vm11, %vm4010_vm12  ;;  %vm4062_vm12 = vcmp.ge.s32.totalorder %v3420_v13, 0  ;;  %vm4074_vm11 = vcmp.lt.s32.totalorder %v3420_v13, 16 }
  0x5c   :  { %v4056_v32 = vsel %vm3538_vm9, 4294967295, %v4055_v32  ;;  %vm3550_vm3 = vmand %vm3526_vm15, %vm4059_vm13 }
  0x5d   :  { %vm3560_vm9 = vmand %vm3485_vm5, %vm4062_vm12  ;;  %vm4069_vm5 = vcmp.lt.s32.totalorder %v3414_v11, 16 }
  0x5e   :  { %vm3568_vm2 = vmand %vm341_vm14, %vm343_vm1  ;;  %vm4072_vm14 = vcmp.lt.s32.totalorder %v3524_v29, 111  ;;  %vm4088_vm1 = vcmp.ge.s32.totalorder %v3424_v14, 0 }
  0x5f   :  { %v4066_v41 = vsel %vm3568_vm2, 4294967295, %v4065_v41  ;;  %vm3575_vm12 = vmpackc.low %vm3532_vm7, %vm4011_vm0  ;;  %vm4081_vm7 = vcmp.ge.s32.totalorder %v3417_v12, 0 }
  0x60   :  { %v4068_v42 = vsel %vm3575_vm12, 4294967295, %v4067_v42  ;;  %vm3583_vm4 = vmand %vm3550_vm3, %vm4069_vm5  ;;  %vm4077_vm3 = vcmp.lt.s32.totalorder %v3524_v29, 112 }
  0x61   :  { %vm4073_vm13 = vmmov %vm4072_vm14 }
  0x62   :  { %vm3597_vm0 = vmand %vm3560_vm9, %vm4074_vm11  ;;  %vm4084_vm11 = vmmov 1  }
  0x63   :  { %vm4078_vm5 = vmmov %vm4077_vm3 }
  0x64   :  { %vm3613_vm9 = vmand %vm3568_vm2, %vm4081_vm7 }
  0xb6   :  { %v2682_v34 = vpop.permute.xlu0 %2681  ;;  %v2692_v35 = vpop.permute.xlu1 %2691 }
  0xb7   :  { %v2684_v37 = vunpack.i.h.bf16 %v2682_v34  ;;  %v2683_v38 = vunpack.i.l.bf16 %v2682_v34  ;;  %v2694_v39 = vunpack.i.h.bf16 %v2692_v35  ;;  %v2693_v40 = vunpack.i.l.bf16 %v2692_v35 }
  0xb9   :  { %v482_v44 = vsel %vm4072_vm14, %v2684_v37, %v2683_v38  ;;  %v481_v45 = vsel %vm4073_vm13, %v2683_v38, %v2684_v37  ;;  %v472_v47 = vsel %vm4077_vm3, %v2693_v40, %v2694_v39  ;;  %v473_v48 = vsel %vm4078_vm5, %v2694_v39, %v2693_v40 }
  0xba   :  { %v2687_v49 = vpop.permute.xlu0 %2686  ;;  %vm4079_vm14 = vnez %v4042_v25  ;;  %vm4080_vm13 = vnez %v4044_v26  ;;  %v2697_v52 = vpop.permute.xlu1 %2696  ;;  %vm4085_vm3 = vnez %v4056_v32 }
  0xbb   :  { %v484_v50 = vsel %vm4079_vm14, %v482_v44, 0.0  ;;  %v483_v51 = vsel %vm4080_vm13, %v481_v45, 0.0  ;;  %v2689_v54 = vunpack.i.h.bf16 %v2687_v49  ;;  %v2688_v55 = vunpack.i.l.bf16 %v2687_v49  ;;  %vm3620_vm5 = vmpackc.low %vm4085_vm3, %vm4084_vm11 }
  0xbc   :  { %v494_v56 = vpack.c.bf16 %v484_v50, %v484_v50  ;;  %v493_v57 = vpack.c.bf16 %v483_v51, %v483_v51  ;;  %v4087_v58 = vsel %vm3620_vm5, 4294967295, %v4086_v58  ;;  %vm4089_vm13 = vnez %v4039_v24 }
  0xbd   :  { %vm3628_vm14 = vmand %vm4089_vm13, %vm4088_vm1  ;;  %v2699_v60 = vunpack.i.h.bf16 %v2697_v52  ;;  %v2698_v61 = vunpack.i.l.bf16 %v2697_v52  ;;  %vm4092_vm11 = vcmp.lt.s32.totalorder %v3524_v29, 113  ;;  %vm4094_vm5 = vcmask 1043456  }
  0xbe   :  { %v463_v62 = vsel %vm4092_vm11, %v2688_v55, %v2689_v54  ;;  %vm4093_vm3 = vmmov %vm4092_vm11  ;;  %2294 = vmatprep.subr.msk.bf16.mxu0 %vm4094_vm5, %v494_v56  ;;  %vm4016_vm1 = vcmp.lt.s32.totalorder %v3524_v29, 1  ;;  %vm4096_vm13 = vcmp.lt.s32.totalorder %v3417_v12, 16  ;;  %vm4099_vm11 = vcmp.lt.s32.totalorder %v3524_v29, 127  ;;  %v2707_v8 = vpop.permute.xlu1 %2706  ;;  %v2702_v10 = vpop.permute.xlu0 %2701 }
  0xbf   :  { %v464_v63 = vsel %vm4093_vm3, %v2689_v54, %v2688_v55  ;;  %vm4095_vm2 = vmmov %vm4094_vm5  ;;  %v2299_v5 = vpack.c.bf16 %v472_v47, %v463_v62  ;;  %v455_v6 = vsel %vm4099_vm11, %v2699_v60, %v2698_v61  ;;  %vm4017_vm5 = vcmp.lt.s32.totalorder %v3524_v29, 15  ;;  %v631_v62 = vld [vmem:[%s3992_s6] sm:$0xff] }
  0xc0   :  { %v508_v2 = vsel %vm4095_vm2, %v493_v57, 0  ;;  %vm3647_vm12 = vmand %vm3613_vm9, %vm4096_vm13  ;;  %v2296_v4 = vpack.c.bf16 %v473_v48, %v464_v63  ;;  %vm4100_vm2 = vcmp.lt.s32.totalorder %v3424_v14, 16  ;;  %v2302_v15 = vpack.c.bf16 %v455_v6, %v3382_v1 }
  0xc1   :  { %520 = vmatpush1.bf16.msra.mxu0 %v508_v2  ;;  %vm3658_vm3 = vmand %vm3628_vm14, %vm4100_vm2  ;;  %v2709_v16 = vunpack.i.h.bf16 %v2707_v8  ;;  %v2708_v17 = vunpack.i.l.bf16 %v2707_v8  ;;  %vm4104_vm13 = vcmp.ge.s32.totalorder %v3420_v13, 0  ;;  %vm4107_vm14 = vnez %v4029_v18 }
  0xc2   :  { %vm4103_vm9 = vmmov %vm4099_vm11  ;;  %v2704_v22 = vunpack.i.h.bf16 %v2702_v10  ;;  %v2703_v24 = vunpack.i.l.bf16 %v2702_v10  ;;  %v2717_v33 = vpop.permute.xlu1 %2716  ;;  %v2712_v34 = vpop.permute.xlu0 %2711 }
  0xc3   :  { %v454_v12 = vsel %vm4103_vm9, %v2698_v61, %v2699_v60  ;;  %vm3669_vm11 = vmand %vm3526_vm15, %vm4104_vm13  ;;  %vm4109_vm9 = vcmp.ge.s32.totalorder %v3406_v7, 0  ;;  %v445_v28 = vsel %vm4016_vm1, %v2708_v17, %v2709_v16  ;;  %v446_v30 = vsel %vm4016_vm1, %v2709_v16, %v2708_v17 }
  0xc4   :  { %vm4108_vm2 = vmpackc.low %vm4058_vm10, %vm4107_vm14  ;;  %v2305_v31 = vpack.c.bf16 %v454_v12, %v3377_v0  ;;  %v436_v32 = vsel %vm4017_vm5, %v2703_v24, %v2704_v22  ;;  %v437_v35 = vsel %vm4017_vm5, %v2704_v22, %v2703_v24  ;;  %v2719_v37 = vunpack.i.h.bf16 %v2717_v33 }
  0xc5   :  { %2297 = vmatprep.subr.msk.bf16.mxu0 %vm4108_vm2, %v2296_v4  ;;  %vm3682_vm7 = vmand %vm3526_vm15, %vm4109_vm9  ;;  %vm4113_vm2 = vcmp.lt.s32.totalorder %v3420_v13, 16  ;;  %v2308_v36 = vpack.c.bf16 %v445_v28, %v436_v32  ;;  %v2718_v38 = vunpack.i.l.bf16 %v2717_v33  ;;  %vm4117_vm1 = vcmp.lt.s32.totalorder %v3406_v7, 16 }
  0xc6   :  { %vm4112_vm15 = vmpackc.low %vm3511_vm8, %vm3477_vm6  ;;  %v2714_v39 = vunpack.i.h.bf16 %v2712_v34  ;;  %v2713_v40 = vunpack.i.l.bf16 %v2712_v34  ;;  %vm4122_vm6 = vcmp.lt.s32.totalorder %v3524_v29, 16  ;;  %v2311_v7 = vpack.c.bf16 %v446_v30, %v437_v35 }
  0xc7   :  { %2300 = vmatpush1.bf16.msk.msra.mxu0 %vm4112_vm15, %v2299_v5  ;;  %vm3708_vm13 = vmand %vm3669_vm11, %vm4113_vm2  ;;  %vm4116_vm15 = vnez %v4068_v42  ;;  %vm4120_vm11 = vcmp.ge.s32.totalorder %v3424_v14, 0  ;;  %vm4121_vm2 = vnez %v4066_v41  ;;  %v427_v44 = vsel %vm4122_vm6, %v2718_v38, %v2719_v37 }
  0xc8   :  { %2303 = vmatprep.subr.msk.bf16.mxu0 %vm4116_vm15, %v2302_v15  ;;  %vm3720_vm9 = vmand %vm3682_vm7, %vm4117_vm1  ;;  %vm4123_vm15 = vcmp.ge.s32.totalorder %v3411_v9, 0  ;;  %vm4124_vm7 = vnez %v4087_v58  ;;  %vm4125_vm1 = vcmp.lt.s32.totalorder %v3524_v29, 17 }
  0xc9   :  { %vm351_vm5 = vmand %vm4121_vm2, %vm4120_vm11  ;;  %v418_v45 = vsel %vm4125_vm1, %v2713_v40, %v2714_v39  ;;  %vm4132_vm11 = vcmp.lt.s32.totalorder %v3411_v9, 16  ;;  %v495_v9 = vld [vmem:[%s3989_s3] sm:$0xf] }
  0xca   :  { %vm359_vm8 = vmand %vm4121_vm2, %vm4123_vm15  ;;  %v2314_v41 = vpack.c.bf16 %v427_v44, %v418_v45  ;;  %vm4129_vm2 = vcmp.lt.s32.totalorder %v3424_v14, 16 }
  0xcb   :  { %2306 = vmatpush1.bf16.msk.msra.mxu0 %vm4124_vm7, %v2305_v31  ;;  %vm4126_vm14 = vmmov %vm4122_vm6 }
  0xcc   :  { %v428_v47 = vsel %vm4126_vm14, %v2719_v37, %v2718_v38  ;;  %vm4127_vm6 = vmmov %vm4125_vm1 }
  0xcd   :  { %v419_v48 = vsel %vm4127_vm6, %v2714_v39, %v2713_v40  ;;  %vm4128_vm15 = vmpackc.low %vm3597_vm0, %vm3583_vm4  ;;  %vm4137_vm6 = vcmp.lt.s32.totalorder %v3524_v29, 111 }
  0xce   :  { %2309 = vmatprep.subr.msk.bf16.mxu0 %vm4128_vm15, %v2308_v36  ;;  %vm3753_vm1 = vmand %vm351_vm5, %vm4129_vm2  ;;  %v2317_v51 = vpack.c.bf16 %v428_v47, %v419_v48  ;;  %vm4139_vm2 = vnez %v4042_v25 }
  0xcf   :  { %vm3759_vm7 = vmand %vm359_vm8, %vm4132_vm11  ;;  %vm4020_vm11 = vcmask 588800   ;;  %v500_v14 = vpop.permute.xlu0 %499 }
  0xd0   :  { %vm4135_vm14 = vmpackc.low %vm3658_vm3, %vm3647_vm12 }
  0xd1   :  { %2312 = vmatpush1.bf16.msk.msra.mxu0 %vm4135_vm14, %v2311_v7  ;;  %vm4136_vm5 = vmpackc.low %vm3720_vm9, %vm3708_vm13  ;;  %vm4140_vm14 = vnez %v4044_v26 }
  0xd2   :  { %2315 = vmatprep.subr.msk.bf16.mxu0 %vm4136_vm5, %v2314_v41  ;;  %vm4021_vm8 = vmpackc.low %vm3759_vm7, %vm3753_vm1  ;;  %vm4141_vm5 = vcmp.lt.s32.totalorder %v3524_v29, 112 }
  0xd3   :  { %vm4138_vm15 = vmmov %vm4137_vm6 }
  0xd5   :  { %2318 = vmatpush1.bf16.msk.msra.mxu0 %vm4021_vm8, %v2317_v51 }
  0xd8   :  { %2319 = vmatmul.mubr.msk.bf16.vlgmr.msra.gmra.mxu0 %vm4020_vm11, %v495_v9  ;;  %vm4144_vm11 = vcmask 1043456  }
 0x198   :  { %v547_v52 = vpop.f32.mrf.mxu0 }
 0x199   :  { %v548_v53 = vadd.f32 %v547_v52, %v500_v14 }
 0x19a   :  { %v549_v54 = vpop.f32.mrf.mxu0 }
 0x19b   :  { %v550_v55 = vadd.f32 %v549_v54, %v500_v14  ;;  %v554_v57 = vmax.f32 %v548_v53, 0.0 }
 0x19c   :  { %v551_v56 = vpop.f32.mrf.mxu0 }
 0x19d   :  { %v555_v59 = vmax.f32 %v550_v55, 0.0 }
 0x19e   :  { %v552_v60 = vpop.f32.mrf.mxu0 }
 0x19f   :  { %v2731_v61 = vpack.i.bf16 %v555_v59, %v554_v57 }
 0x1a1   :  { %2732 = vrot.lane.b32.xlu0 %v2731_v61, %s2916_s7  ;;  %2722 = vrot.lane.b32.xlu1 %v2731_v61, %s2915_s30 }
 0x1a5   :  { %2742 = vrot.lane.b32.xlu0 %v2731_v61, %s2920_s0  ;;  %2727 = vrot.lane.b32.xlu1 %v2731_v61, %s2917_s12 }
 0x1a9   :  { %2752 = vrot.lane.b32.xlu0 %v2731_v61, %s2923_s16  ;;  %2737 = vrot.lane.b32.xlu1 %v2731_v61, %s2918_s13 }
 0x1ad   :  { %634 = vperm.xlu0 %2720, %v631_v62   ;;  %2747 = vrot.lane.b32.xlu1 %v2731_v61, %s2919_s14 }
 0x1b1   :  { %2757 = vrot.lane.b32.xlu1 %v2731_v61, %s2922_s15 }
 0x213   :  { %v2733_v63 = vpop.permute.xlu0 %2732  ;;  %v2723_v2 = vpop.permute.xlu1 %2722 }
 0x214   :  { %v2725_v4 = vunpack.i.h.bf16 %v2723_v2  ;;  %v2724_v5 = vunpack.i.l.bf16 %v2723_v2  ;;  %v2735_v6 = vunpack.i.h.bf16 %v2733_v63  ;;  %v2734_v8 = vunpack.i.l.bf16 %v2733_v63 }
 0x216   :  { %v617_v10 = vsel %vm4137_vm6, %v2725_v4, %v2724_v5  ;;  %v616_v12 = vsel %vm4138_vm15, %v2724_v5, %v2725_v4  ;;  %v609_v31 = vsel %vm4141_vm5, %v2735_v6, %v2734_v8  ;;  %vm4142_vm6 = vcmp.lt.s32.totalorder %v3524_v29, 113 }
 0x217   :  { %v2728_v15 = vpop.permute.xlu1 %2727  ;;  %v619_v16 = vsel %vm4139_vm2, %v617_v10, 0.0  ;;  %v618_v17 = vsel %vm4140_vm14, %v616_v12, 0.0  ;;  %v2743_v24 = vpop.permute.xlu0 %2742  ;;  %vm4143_vm15 = vmmov %vm4142_vm6 }
 0x218   :  { %v2730_v20 = vunpack.i.h.bf16 %v2728_v15  ;;  %v2729_v22 = vunpack.i.l.bf16 %v2728_v15  ;;  %v629_v1 = vpack.c.bf16 %v619_v16, %v619_v16  ;;  %v628_v28 = vpack.c.bf16 %v618_v17, %v618_v17  ;;  %vm4145_vm2 = vmmov %vm4144_vm11 }
 0x219   :  { %vm4146_vm14 = vmmov %vm4141_vm5  ;;  %v2745_v37 = vunpack.i.h.bf16 %v2743_v24  ;;  %v2744_v38 = vunpack.i.l.bf16 %v2743_v24  ;;  %vm4147_vm5 = vnez %v4029_v18 }
 0x21a   :  { %v601_v30 = vsel %vm4142_vm6, %v2730_v20, %v2729_v22  ;;  %v600_v32 = vsel %vm4143_vm15, %v2729_v22, %v2730_v20  ;;  %2320 = vmatprep.subr.msk.bf16.mxu1 %vm4144_vm11, %v629_v1  ;;  %v641_v26 = vsel %vm4145_vm2, %v628_v28, 0  ;;  %v608_v36 = vsel %vm4146_vm14, %v2734_v8, %v2735_v6  ;;  %vm4148_vm6 = vmpackc.low %vm4058_vm10, %vm4147_vm5 }
 0x21b   :  { %v2322_v33 = vpack.c.bf16 %v609_v31, %v601_v30  ;;  %v2738_v25 = vpop.permute.xlu1 %2737  ;;  %653 = vmatpush1.bf16.msra.mxu1 %v641_v26  ;;  %v2325_v39 = vpack.c.bf16 %v608_v36, %v600_v32  ;;  %vm4149_vm11 = vcmp.lt.s32.totalorder %v3524_v29, 127  ;;  %v2753_v44 = vpop.permute.xlu0 %2752  ;;  %vm4151_vm2 = vnez %v4047_v27 }
 0x21c   :  { %v2740_v34 = vunpack.i.h.bf16 %v2738_v25  ;;  %v2739_v35 = vunpack.i.l.bf16 %v2738_v25  ;;  %vm4150_vm15 = vmmov %vm4149_vm11  ;;  %vm4152_vm14 = vnez %v4034_v21  ;;  %vm4154_vm10 = vcmp.lt.s32.totalorder %v3524_v29, 15 }
 0x21d   :  { %2323 = vmatprep.subr.msk.bf16.mxu1 %vm4148_vm6, %v2322_v33  ;;  %vm4153_vm8 = vmpackc.low %vm4151_vm2, %vm4152_vm14  ;;  %v576_v18 = vsel %vm4154_vm10, %v2744_v38, %v2745_v37  ;;  %vm4155_vm5 = vnez %v4068_v42  ;;  %v2755_v19 = vunpack.i.h.bf16 %v2753_v44  ;;  %v2754_v51 = vunpack.i.l.bf16 %v2753_v44 }
 0x21e   :  { %v593_v40 = vsel %vm4149_vm11, %v2740_v34, %v2739_v35  ;;  %v592_v7 = vsel %vm4150_vm15, %v2739_v35, %v2740_v34  ;;  %vm4156_vm6 = vcmp.lt.s32.totalorder %v3524_v29, 1  ;;  %vm4159_vm15 = vmmov %vm4154_vm10  ;;  %vm4161_vm14 = vcmp.lt.s32.totalorder %v3524_v29, 17 }
 0x21f   :  { %v2328_v45 = vpack.c.bf16 %v593_v40, %v555_v59  ;;  %v2748_v47 = vpop.permute.xlu1 %2747  ;;  %2326 = vmatpush1.bf16.msk.msra.mxu1 %vm4153_vm8, %v2325_v39  ;;  %v2331_v9 = vpack.c.bf16 %v592_v7, %v554_v57  ;;  %vm4157_vm11 = vmmov %vm4156_vm6  ;;  %vm4158_vm8 = vnez %v4087_v58  ;;  %v577_v42 = vsel %vm4159_vm15, %v2745_v37, %v2744_v38 }
 0x220   :  { %v2750_v48 = vunpack.i.h.bf16 %v2748_v47  ;;  %v2749_v41 = vunpack.i.l.bf16 %v2748_v47  ;;  %vm4160_vm2 = vmpackc.low %vm3597_vm0, %vm3583_vm4  ;;  %v560_v55 = vsel %vm4161_vm14, %v2754_v51, %v2755_v19  ;;  %vm4162_vm10 = vcmp.lt.s32.totalorder %v3524_v29, 16 }
 0x221   :  { %2329 = vmatprep.subr.msk.bf16.mxu1 %vm4155_vm5, %v2328_v45  ;;  %vm4163_vm5 = vmmov %vm4162_vm10  ;;  %vm3888_vm15 = vcmp.lt.s32.totalorder %v415_v23, 256 }
 0x222   :  { %v584_v14 = vsel %vm4156_vm6, %v2749_v41, %v2750_v48  ;;  %v585_v52 = vsel %vm4157_vm11, %v2750_v48, %v2749_v41  ;;  %vm4164_vm6 = vmpackc.low %vm3658_vm3, %vm3647_vm12  ;;  %vm4168_vm12 = vcmask 588800   ;;  %vm699_vm3 = vcmp.lt.s32.totalorder %v3524_v29, 126 }
 0x223   :  { %v2334_v27 = vpack.c.bf16 %v584_v14, %v576_v18  ;;  %v2758_v53 = vpop.permute.xlu1 %2757  ;;  %2332 = vmatpush1.bf16.msk.msra.mxu1 %vm4158_vm8, %v2331_v9  ;;  %v2337_v56 = vpack.c.bf16 %v585_v52, %v577_v42  ;;  %vm4165_vm4 = vmmov %vm4161_vm14 }
 0x224   :  { %v2760_v21 = vunpack.i.h.bf16 %v2758_v53  ;;  %v2759_v54 = vunpack.i.l.bf16 %v2758_v53  ;;  %v561_v43 = vsel %vm4165_vm4, %v2755_v19, %v2754_v51  ;;  %vm4166_vm0 = vmpackc.low %vm3720_vm9, %vm3708_vm13  ;;  %vm4169_vm13 = vcmp.lt.s32.totalorder %v3524_v29, 127 }
 0x225   :  { %2335 = vmatprep.subr.msk.bf16.mxu1 %vm4160_vm2, %v2334_v27  ;;  %vm4167_vm11 = vmpackc.low %vm3759_vm7, %vm3753_vm1  ;;  %vm716_vm7 = vcmp.lt.s32.totalorder %v3524_v29, 96  ;;  %vm4171_vm1 = vcmp.lt.s32.totalorder %v3524_v29, 112 }
 0x226   :  { %v568_v57 = vsel %vm4162_vm10, %v2759_v54, %v2760_v21  ;;  %v569_v58 = vsel %vm4163_vm5, %v2760_v21, %v2759_v54  ;;  %vm4170_vm9 = vmmov %vm4169_vm13 }
 0x227   :  { %v2340_v59 = vpack.c.bf16 %v568_v57, %v560_v55  ;;  %2338 = vmatpush1.bf16.msk.msra.mxu1 %vm4164_vm6, %v2337_v56  ;;  %v2343_v46 = vpack.c.bf16 %v569_v58, %v561_v43  ;;  %vm4172_vm8 = vmmov %vm4171_vm1 }
 0x228   :  { %v635_v11 = vpop.permute.xlu0 %634 }
 0x229   :  { %2341 = vmatprep.subr.msk.bf16.mxu1 %vm4166_vm0, %v2340_v59 }
 0x22b   :  { %2344 = vmatpush1.bf16.msk.msra.mxu1 %vm4167_vm11, %v2343_v46 }
 0x22e   :  { %2345 = vmatmul.mubr.msk.bf16.vlgmr.msra.gmra.mxu1 %vm4168_vm12, %v630_v3 }
 0x2ee   :  { %v680_v60 = vpop.f32.mrf.mxu1 }
 0x2ef   :  { %v681_v13 = vadd.f32 %v680_v60, %v635_v11 }
 0x2f0   :  { %v682_v61 = vpop.f32.mrf.mxu1 }
 0x2f1   :  { %v687_v0 = vmax.f32 %v681_v13, 0.0  ;;  %v683_v62 = vadd.f32 %v682_v61, %v635_v11 }
 0x2f2   :  { %v684_v63 = vpop.f32.mrf.mxu1 }
 0x2f3   :  { %v688_v2 = vmax.f32 %v683_v62, 0.0  ;;  %689 = vrot.lane.b32.xlu1 %v687_v0, %s2918_s13 }
 0x2f4   :  { %v685_v50 = vpop.f32.mrf.mxu1 }
 0x2f5   :  { %691 = vrot.lane.b32.xlu0 %v688_v2, %s2918_s13 }
 0x2f7   :  { %695 = vrot.lane.b32.xlu1 %v687_v0, %s2925_s28 }
 0x2f9   :  { %697 = vrot.lane.b32.xlu0 %v688_v2, %s2925_s28 }
 0x365   :  { %v690_v49 = vpop.permute.xlu1 %689 }
 0x367   :  { %v692_v4 = vpop.permute.xlu0 %691 }
 0x368   :  { %v693_v8 = vsel %vm4169_vm13, %v690_v49, %v692_v4  ;;  %v694_v10 = vsel %vm4170_vm9, %v692_v4, %v690_v49 }
 0x369   :  { %v696_v5 = vpop.permute.xlu1 %695 }
 0x36b   :  { %v698_v6 = vpop.permute.xlu0 %697 }
 0x36c   :  { %v700_v12 = vsel %vm699_vm3, %v696_v5, %v698_v6  ;;  %v701_v15 = vsel %vm699_vm3, %v698_v6, %v696_v5 }
 0x36d   :  { %v702_v16 = vmax.f32 %v693_v8, %v700_v12  ;;  %v703_v17 = vmax.f32 %v694_v10, %v701_v15 }
 0x36f   :  { %v705_v20 = vmax.f32 %v688_v2, %v703_v17  ;;  %v704_v22 = vmax.f32 %v687_v0, %v702_v16 }
 0x371   :  { %708 = vrot.lane.b32.xlu0 %v705_v20, %s2916_s7  ;;  %706 = vrot.lane.b32.xlu1 %v704_v22, %s2916_s7 }
 0x375   :  { %714 = vrot.lane.b32.xlu0 %v705_v20, %s2926_s5  ;;  %712 = vrot.lane.b32.xlu1 %v704_v22, %s2926_s5 }
 0x3e3   :  { %v709_v24 = vpop.permute.xlu0 %708  ;;  %v707_v1 = vpop.permute.xlu1 %706 }
 0x3e4   :  { %v710_v30 = vsel %vm4171_vm1, %v707_v1, %v709_v24  ;;  %v711_v32 = vsel %vm4172_vm8, %v709_v24, %v707_v1 }
 0x3e7   :  { %v715_v28 = vpop.permute.xlu0 %714  ;;  %v713_v31 = vpop.permute.xlu1 %712 }
 0x3e8   :  { %v717_v33 = vsel %vm716_vm7, %v713_v31, %v715_v28  ;;  %v718_v25 = vsel %vm716_vm7, %v715_v28, %v713_v31 }
 0x3e9   :  { %v719_v26 = vmax.f32 %v710_v30, %v717_v33  ;;  %v720_v34 = vmax.f32 %v711_v32, %v718_v25 }
 0x3eb   :  { %v721_v35 = vmax.f32 %v704_v22, %v719_v26  ;;  %v722_v36 = vmax.f32 %v705_v20, %v720_v34 }
 0x3ed   :  { %723 = vst [vmem:[#allocation3] sm:$0xff] %v721_v35  ;;  %724 = vst [vmem:[#allocation3 + $0x8] sm:$0xff] %v722_v36 }
 0x3f4   :  { %v725_v38 = vld [vmem:[#allocation3] ss:$8 sm:$0x3]  ;;  %v732_v39 = vld [vmem:[#allocation3 + $0x1] ss:$8 sm:$0x3] }
 0x3f5   :  { %730 = vst.msk [vmem:[#allocation4] sm:$0x3] %vm3888_vm15, %v725_v38  ;;  %733 = vst.msk [vmem:[#allocation4 + $0x2] sm:$0x3] %vm3888_vm15, %v732_v39 }
 0x3f6   :  { %v735_v29 = vld [vmem:[#allocation3 + $0x2] ss:$8 sm:$0x3]  ;;  %v738_v40 = vld [vmem:[#allocation3 + $0x3] ss:$8 sm:$0x3] }
 0x3f7   :  { %736 = vst.msk [vmem:[#allocation4 + $0x4] sm:$0x3] %vm3888_vm15, %v735_v29  ;;  %739 = vst.msk [vmem:[#allocation4 + $0x6] sm:$0x3] %vm3888_vm15, %v738_v40 }
 0x3f8   :  { %v741_v44 = vld [vmem:[#allocation3 + $0x4] ss:$8 sm:$0x3]  ;;  %v744_v7 = vld [vmem:[#allocation3 + $0x5] ss:$8 sm:$0x3] }
 0x3f9   :  { %742 = vst.msk [vmem:[#allocation4 + $0x8] sm:$0x3] %vm3888_vm15, %v741_v44  ;;  %745 = vst.msk [vmem:[#allocation4 + $0xa] sm:$0x3] %vm3888_vm15, %v744_v7 }
 0x3fa   :  { %v747_v45 = vld [vmem:[#allocation3 + $0x6] ss:$8 sm:$0x3]  ;;  %v750_v47 = vld [vmem:[#allocation3 + $0x7] ss:$8 sm:$0x3] }
 0x3fb   :  { %748 = vst.msk [vmem:[#allocation4 + $0xc] sm:$0x3] %vm3888_vm15, %v747_v45  ;;  %751 = vst.msk [vmem:[#allocation4 + $0xe] sm:$0x3] %vm3888_vm15, %v750_v47 }
 0x3fc   :  { %2911 = dma.done.wait [#allocation5], 16384 }
 0x3fd   :  { %2912 = vsyncadd [#allocation5], 4294950912  ;;  %v2761_v48 = vld [vmem:[#allocation2 + $0x78] sm:$0xff]   ;;  %v2765_v51 = vld [vmem:[#allocation2 + $0x70] sm:$0xff]   ;;  %v3909_v60 = vshrl.u32 %v415_v23, 7  ;;  %vm2928_vm2 = vmmov 0  }
 0x3fe   :  { %v2762_v41 = vld [vmem:[#allocation2 + $0xf8] sm:$0xff]   ;;  %2478 = vmatprep.subr.bf16.mxu0 %v2761_v48  ;;  %v2766_v9 = vld [vmem:[#allocation2 + $0xf0] sm:$0xff]   ;;  %v2769_v27 = vld [vmem:[#allocation2 + $0x68] sm:$0xff]   ;;  %vm2220_vm14 = vcmask 261120   ;;  %s2929_s0 = smov [#allocation6]   ;;  %vm2264_vm10 = vcmask 73728  }
 0x3ff   :  { %v2763_v18 = vld [vmem:[#allocation2 + $0x38] sm:$0xff]   ;;  %2500 = vmatprep.subr.bf16.mxu1 %v2762_v41  ;;  %v2767_v14 = vld [vmem:[#allocation2 + $0x30] sm:$0xff]   ;;  %v2770_v53 = vld [vmem:[#allocation2 + $0xe8] sm:$0xff]   ;;  %v766_v63 = vsub.s32 1, %v3909_v60  ;;  %v774_v50 = vsub.s32 3, %v3909_v60  ;;  %v762_v4 = vsub.s32 0, %v3909_v60 }
 0x400   :  { %v2764_v19 = vld [vmem:[#allocation2 + $0xb8] sm:$0xff]   ;;  %2479 = vmatpush3.bf16.msra.mxu0 %v2763_v18  ;;  %v2768_v52 = vld [vmem:[#allocation2 + $0xb0] sm:$0xff]   ;;  %v2771_v21 = vld [vmem:[#allocation2 + $0x28] sm:$0xff]   ;;  %v770_v5 = vsub.s32 2, %v3909_v60  ;;  %v782_v8 = vsub.s32 5, %v3909_v60  ;;  %v790_v12 = vsub.s32 7, %v3909_v60 }
 0x401   :  { %2501 = vmatpush3.bf16.msra.mxu1 %v2764_v19  ;;  %2480 = vmatprep.subr.bf16.mxu0 %v2765_v51  ;;  %v2772_v54 = vld [vmem:[#allocation2 + $0xa8] sm:$0xff]   ;;  %v2773_v42 = vld [vmem:[#allocation2 + $0x60] sm:$0xff]   ;;  %v2777_v58 = vld [vmem:[#allocation2 + $0x58] sm:$0xff]   ;;  %s2272_s15 = sshll.u32 %s2929_s0, 4  ;;  %s2273_s15 = int_to_ptr.vmem [resolvable:$true] %s2272_s15 }
 0x402   :  { %2502 = vmatprep.subr.bf16.mxu1 %v2766_v9  ;;  %v2774_v55 = vld [vmem:[#allocation2 + $0xe0] sm:$0xff]   ;;  %v2778_v59 = vld [vmem:[#allocation2 + $0xd8] sm:$0xff]   ;;  %v2781_v3 = vld [vmem:[#allocation2 + $0x50] sm:$0xff]   ;;  %s2891_s16 = scalar_lea.vmem %s2273_s15, 16  ;;  %s2895_s17 = scalar_lea.vmem %s2273_s15, 32 }
 0x403   :  { %v2775_v56 = vld [vmem:[#allocation2 + $0x20] sm:$0xff]   ;;  %v2779_v43 = vld [vmem:[#allocation2 + $0x18] sm:$0xff]   ;;  %v2782_v11 = vld [vmem:[#allocation2 + $0xd0] sm:$0xff]   ;;  %p2892_p0 = scmp.ne.s32.totalorder %s2273_s15, %s2891_s16  ;;  %p2896_p1 = scmp.lt.s32.totalorder %s2273_s15, %s2273_s15 }
 0x404   :  { %2481 = vmatpush3.bf16.msra.mxu0 %v2767_v14  ;;  %v2776_v57 = vld [vmem:[#allocation2 + $0xa0] sm:$0xff]   ;;  %v2780_v46 = vld [vmem:[#allocation2 + $0x98] sm:$0xff]   ;;  %v2783_v13 = vld [vmem:[#allocation2 + $0x10] sm:$0xff]   ;;  %p2897_p2 = scmp.lt.s32.totalorder %s2895_s17, %s2891_s16 }
 0x405   :  { %2503 = vmatpush3.bf16.msra.mxu1 %v2768_v52  ;;  %2482 = vmatprep.subr.bf16.mxu0 %v2769_v27  ;;  %v2784_v61 = vld [vmem:[#allocation2 + $0x90] sm:$0xff]   ;;  %v2785_v0 = vld [vmem:[#allocation2 + $0x48] sm:$0xff]   ;;  %v2789_v23 = vld [vmem:[#allocation2 + $0x40] sm:$0xff]  }
 0x406   :  { %2504 = vmatprep.subr.bf16.mxu1 %v2770_v53  ;;  %v2786_v62 = vld [vmem:[#allocation2 + $0xc8] sm:$0xff]   ;;  %v2790_v6 = vld [vmem:[#allocation2 + $0xc0] sm:$0xff]   ;;  %v3917_v16 = vld [vmem:[#allocation4] sm:$0xff]  ;;  %p2898_p3 = por %p2897_p2, %p2896_p1 }
 0x407   :  { %v2787_v2 = vld [vmem:[#allocation2 + $0x8] sm:$0xff]   ;;  %v2791_v10 = vld [vmem:[#allocation2] sm:$0xff]   ;;  %v767_v17 = vrot.slane %v3917_v16, %v766_v63  ;;  %v775_v20 = vrot.slane %v3917_v16, %v774_v50  ;;  %v763_v22 = vrot.slane %v3917_v16, %v762_v4  ;;  %v771_v24 = vrot.slane %v3917_v16, %v770_v5  ;;  %v2793_v1 = vld [vmem:[#allocation2 + $0x178] sm:$0xff]  }
 0x408   :  { %2483 = vmatpush3.bf16.msra.mxu0 %v2771_v21  ;;  %v2788_v49 = vld [vmem:[#allocation2 + $0x88] sm:$0xff]   ;;  %v2792_v15 = vld [vmem:[#allocation2 + $0x80] sm:$0xff]   ;;  %v2794_v28 = vld [vmem:[#allocation2 + $0x1f8] sm:$0xff]   ;;  %v783_v31 = vrot.slane %v3917_v16, %v782_v8  ;;  %v791_v30 = vrot.slane %v3917_v16, %v790_v12  ;;  %p2899_p4 = pnand %p2898_p3, %p2892_p0 }
 0x409   :  { %2505 = vmatpush3.bf16.msra.mxu1 %v2772_v54  ;;  %2484 = vmatprep.subr.bf16.mxu0 %v2773_v42  ;;  %v841_v32 = vpack.c.bf16 %v767_v17, %v767_v17  ;;  %v843_v33 = vpack.c.bf16 %v775_v20, %v775_v20  ;;  %v840_v25 = vpack.c.bf16 %v763_v22, %v763_v22  ;;  %v2795_v34 = vld [vmem:[#allocation2 + $0x138] sm:$0xff]   ;;  %v2797_v36 = vld [vmem:[#allocation2 + $0x170] sm:$0xff]   ;;  %v2801_v44 = vld [vmem:[#allocation2 + $0x168] sm:$0xff]  }
 0x40a   :  { %2506 = vmatprep.subr.bf16.mxu1 %v2774_v55  ;;  %v842_v26 = vpack.c.bf16 %v771_v24, %v771_v24  ;;  %v2796_v35 = vld [vmem:[#allocation2 + $0x1b8] sm:$0xff]   ;;  %v845_v37 = vpack.c.bf16 %v783_v31, %v783_v31  ;;  %v847_v38 = vpack.c.bf16 %v791_v30, %v791_v30  ;;  %v2798_v39 = vld [vmem:[#allocation2 + $0x1f0] sm:$0xff]   ;;  %v2802_v7 = vld [vmem:[#allocation2 + $0x1e8] sm:$0xff]   ;;  %v778_v55 = vsub.s32 4, %v3909_v60 }
 0x40b   :  { %1913 = vmatprep.mubr.bf16.mxu0 %v841_v32  ;;  %1953 = vmatprep.mubr.bf16.mxu1 %v843_v33  ;;  %v2799_v29 = vld [vmem:[#allocation2 + $0x130] sm:$0xff]   ;;  %v2803_v45 = vld [vmem:[#allocation2 + $0x128] sm:$0xff]   ;;  %v2805_v48 = vld [vmem:[#allocation2 + $0x160] sm:$0xff]  }
 0x40c   :  { %2485 = vmatpush3.bf16.msra.mxu0 %v2775_v56  ;;  %v2800_v40 = vld [vmem:[#allocation2 + $0x1b0] sm:$0xff]   ;;  %v2804_v47 = vld [vmem:[#allocation2 + $0x1a8] sm:$0xff]   ;;  %v2806_v41 = vld [vmem:[#allocation2 + $0x1e0] sm:$0xff]  }
 0x40d   :  { %2507 = vmatpush3.bf16.msra.mxu1 %v2776_v57  ;;  %2486 = vmatprep.subr.bf16.mxu0 %v2777_v58  ;;  %v2807_v18 = vld [vmem:[#allocation2 + $0x120] sm:$0xff]   ;;  %v2809_v51 = vld [vmem:[#allocation2 + $0x158] sm:$0xff]   ;;  %v2813_v27 = vld [vmem:[#allocation2 + $0x150] sm:$0xff]   ;;  %v786_v57 = vsub.s32 6, %v3909_v60 }
 0x40e   :  { %2508 = vmatprep.subr.bf16.mxu1 %v2778_v59  ;;  %v2808_v19 = vld [vmem:[#allocation2 + $0x1a0] sm:$0xff]   ;;  %v2810_v9 = vld [vmem:[#allocation2 + $0x1d8] sm:$0xff]   ;;  %v2814_v53 = vld [vmem:[#allocation2 + $0x1d0] sm:$0xff]  }
 0x40f   :  { %v2811_v14 = vld [vmem:[#allocation2 + $0x118] sm:$0xff]   ;;  %v2815_v21 = vld [vmem:[#allocation2 + $0x110] sm:$0xff]   ;;  %v2817_v42 = vld [vmem:[#allocation2 + $0x148] sm:$0xff]  }
 0x410   :  { %2487 = vmatpush3.bf16.msra.mxu0 %v2779_v43  ;;  %v2812_v52 = vld [vmem:[#allocation2 + $0x198] sm:$0xff]   ;;  %v2816_v54 = vld [vmem:[#allocation2 + $0x190] sm:$0xff]   ;;  %v2818_v56 = vld [vmem:[#allocation2 + $0x1c8] sm:$0xff]  }
 0x411   :  { %2509 = vmatpush3.bf16.msra.mxu1 %v2780_v46  ;;  %2488 = vmatprep.subr.bf16.mxu0 %v2781_v3  ;;  %v2819_v58 = vld [vmem:[#allocation2 + $0x108] sm:$0xff]   ;;  %v2821_v43 = vld [vmem:[#allocation2 + $0x140] sm:$0xff]   ;;  %v779_v3 = vrot.slane %v3917_v16, %v778_v55  ;;  %v2832_v17 = vld [vmem:[#allocation2 + $0x2b0] sm:$0xff]  }
 0x412   :  { %2510 = vmatprep.subr.bf16.mxu1 %v2782_v11  ;;  %v2820_v59 = vld [vmem:[#allocation2 + $0x188] sm:$0xff]   ;;  %v2822_v46 = vld [vmem:[#allocation2 + $0x1c0] sm:$0xff]   ;;  %v787_v11 = vrot.slane %v3917_v16, %v786_v57  ;;  %v2831_v16 = vld [vmem:[#allocation2 + $0x230] sm:$0xff]  }
 0x413   :  { %v2833_v20 = vld [vmem:[#allocation2 + $0x268] sm:$0xff]   ;;  %v2838_v31 = vld [vmem:[#allocation2 + $0x2e0] sm:$0xff]   ;;  %v2841_v33 = vld [vmem:[#allocation2 + $0x258] sm:$0xff]  }
 0x414   :  { %2489 = vmatpush3.bf16.msra.mxu0 %v2783_v13  ;;  %v2823_v13 = vld [vmem:[#allocation2 + $0x100] sm:$0xff]   ;;  %v2834_v22 = vld [vmem:[#allocation2 + $0x2e8] sm:$0xff]  }
 0x415   :  { %2511 = vmatpush3.bf16.msra.mxu1 %v2784_v61  ;;  %2490 = vmatprep.subr.bf16.mxu0 %v2785_v0  ;;  %v2824_v61 = vld [vmem:[#allocation2 + $0x180] sm:$0xff]   ;;  %v2825_v0 = vld [vmem:[#allocation2 + $0x278] sm:$0xff]   ;;  %v2835_v24 = vld [vmem:[#allocation2 + $0x228] sm:$0xff]  }
 0x416   :  { %2512 = vmatprep.subr.bf16.mxu1 %v2786_v62  ;;  %v844_v62 = vpack.c.bf16 %v779_v3, %v779_v3  ;;  %v2839_v30 = vld [vmem:[#allocation2 + $0x220] sm:$0xff]   ;;  %v2867_v3 = vld [vmem:[#allocation2 + $0x328] sm:$0xff]  }
 0x417   :  { %v2840_v32 = vld [vmem:[#allocation2 + $0x2a0] sm:$0xff]  }
 0x418   :  { %2491 = vmatpush3.bf16.msra.mxu0 %v2787_v2  ;;  %v846_v2 = vpack.c.bf16 %v787_v11, %v787_v11  ;;  %v2868_v11 = vld [vmem:[#allocation2 + $0x3a8] sm:$0xff]   ;;  %v2890_v60 = vld [vmem:[%s3995_s9] sm:$0xff]  }
 0x419   :  { %2513 = vmatpush3.bf16.msra.mxu1 %v2788_v49  ;;  %2492 = vmatprep.subr.bf16.mxu0 %v2789_v23  ;;  %v2826_v49 = vld [vmem:[#allocation2 + $0x2f8] sm:$0xff]  }
 0x41a   :  { %2514 = vmatprep.subr.bf16.mxu1 %v2790_v6  ;;  %v2827_v23 = vld [vmem:[#allocation2 + $0x238] sm:$0xff]  }
 0x41b   :  { %v2828_v6 = vld [vmem:[#allocation2 + $0x2b8] sm:$0xff]  }
 0x41c   :  { %2493 = vmatpush3.bf16.msra.mxu0 %v2791_v10  ;;  %v2829_v10 = vld [vmem:[#allocation2 + $0x270] sm:$0xff]  }
 0x41d   :  { %2515 = vmatpush3.bf16.msra.mxu1 %v2792_v15  ;;  %2522 = vmatprep.subr.bf16.mxu0 %v2793_v1  ;;  %v2830_v15 = vld [vmem:[#allocation2 + $0x2f0] sm:$0xff]   ;;  %v2836_v1 = vld [vmem:[#allocation2 + $0x2a8] sm:$0xff]  }
 0x41e   :  { %2544 = vmatprep.subr.bf16.mxu1 %v2794_v28  ;;  %v2837_v28 = vld [vmem:[#allocation2 + $0x260] sm:$0xff]  }
 0x41f   :  { %1914 = vmatmul.mubr.bf16.vlgmr.msra.gmra.mxu0 %v840_v25  ;;  %v2842_v25 = vld [vmem:[#allocation2 + $0x2d8] sm:$0xff]  }
 0x420   :  { %1954 = vmatmul.mubr.bf16.vlgmr.msra.gmra.mxu1 %v842_v26  ;;  %2523 = vmatpush3.bf16.msra.mxu0 %v2795_v34  ;;  %v2843_v26 = vld [vmem:[#allocation2 + $0x218] sm:$0xff]  }
 0x421   :  { %2545 = vmatpush3.bf16.msra.mxu1 %v2796_v35  ;;  %2524 = vmatprep.subr.bf16.mxu0 %v2797_v36  ;;  %v2844_v34 = vld [vmem:[#allocation2 + $0x298] sm:$0xff]   ;;  %v2845_v35 = vld [vmem:[#allocation2 + $0x250] sm:$0xff]  }
 0x422   :  { %2546 = vmatprep.subr.bf16.mxu1 %v2798_v39  ;;  %1993 = vmatprep.mubr.bf16.mxu0 %v845_v37  ;;  %v2846_v36 = vld [vmem:[#allocation2 + $0x2d0] sm:$0xff]   ;;  %v2849_v39 = vld [vmem:[#allocation2 + $0x248] sm:$0xff]  }
 0x423   :  { %2033 = vmatprep.mubr.bf16.mxu1 %v847_v38  ;;  %v2847_v37 = vld [vmem:[#allocation2 + $0x210] sm:$0xff]  }
 0x424   :  { %2525 = vmatpush3.bf16.msra.mxu0 %v2799_v29  ;;  %v2848_v38 = vld [vmem:[#allocation2 + $0x290] sm:$0xff]   ;;  %v2850_v29 = vld [vmem:[#allocation2 + $0x2c8] sm:$0xff]  }
 0x425   :  { %2547 = vmatpush3.bf16.msra.mxu1 %v2800_v40  ;;  %2526 = vmatprep.subr.bf16.mxu0 %v2801_v44  ;;  %v2851_v40 = vld [vmem:[#allocation2 + $0x208] sm:$0xff]  }
 0x426   :  { %2548 = vmatprep.subr.bf16.mxu1 %v2802_v7  ;;  %v2852_v44 = vld [vmem:[#allocation2 + $0x288] sm:$0xff]   ;;  %v2853_v7 = vld [vmem:[#allocation2 + $0x240] sm:$0xff]  }
 0x428   :  { %2527 = vmatpush3.bf16.msra.mxu0 %v2803_v45  ;;  %v2854_v45 = vld [vmem:[#allocation2 + $0x2c0] sm:$0xff]  }
 0x429   :  { %2549 = vmatpush3.bf16.msra.mxu1 %v2804_v47  ;;  %2528 = vmatprep.subr.bf16.mxu0 %v2805_v48  ;;  %v2855_v47 = vld [vmem:[#allocation2 + $0x200] sm:$0xff]  }
 0x42a   :  { %2550 = vmatprep.subr.bf16.mxu1 %v2806_v41  ;;  %v2856_v48 = vld [vmem:[#allocation2 + $0x280] sm:$0xff]   ;;  %v3945_v41 = vld [vmem:[#allocation4 + $0x8] sm:$0xff] }
 0x42c   :  { %2529 = vmatpush3.bf16.msra.mxu0 %v2807_v18  ;;  %v799_v18 = vrot.slane %v3945_v41, %v766_v63  ;;  %v823_v63 = vrot.slane %v3945_v41, %v790_v12  ;;  %v2863_v12 = vld [vmem:[#allocation2 + $0x330] sm:$0xff]  }
 0x42d   :  { %2551 = vmatpush3.bf16.msra.mxu1 %v2808_v19  ;;  %2530 = vmatprep.subr.bf16.mxu0 %v2809_v51  ;;  %v807_v19 = vrot.slane %v3945_v41, %v774_v50  ;;  %v795_v51 = vrot.slane %v3945_v41, %v762_v4  ;;  %v2859_v4 = vld [vmem:[#allocation2 + $0x338] sm:$0xff]  }
 0x42e   :  { %2552 = vmatprep.subr.bf16.mxu1 %v2810_v9  ;;  %v803_v9 = vrot.slane %v3945_v41, %v770_v5  ;;  %v849_v50 = vpack.c.bf16 %v799_v18, %v799_v18  ;;  %v2860_v5 = vld [vmem:[#allocation2 + $0x3b8] sm:$0xff]  }
 0x430   :  { %2531 = vmatpush3.bf16.msra.mxu0 %v2811_v14  ;;  %v2857_v14 = vld [vmem:[#allocation2 + $0x378] sm:$0xff]  }
 0x431   :  { %2553 = vmatpush3.bf16.msra.mxu1 %v2812_v52  ;;  %2532 = vmatprep.subr.bf16.mxu0 %v2813_v27  ;;  %v2858_v52 = vld [vmem:[#allocation2 + $0x3f8] sm:$0xff]   ;;  %v815_v27 = vrot.slane %v3945_v41, %v782_v8  ;;  %v2862_v8 = vld [vmem:[#allocation2 + $0x3f0] sm:$0xff]  }
 0x432   :  { %2554 = vmatprep.subr.bf16.mxu1 %v2814_v53  ;;  %v851_v53 = vpack.c.bf16 %v807_v19, %v807_v19 }
 0x434   :  { %2533 = vmatpush3.bf16.msra.mxu0 %v2815_v21  ;;  %v848_v21 = vpack.c.bf16 %v795_v51, %v795_v51 }
 0x435   :  { %2555 = vmatpush3.bf16.msra.mxu1 %v2816_v54  ;;  %2534 = vmatprep.subr.bf16.mxu0 %v2817_v42  ;;  %v850_v54 = vpack.c.bf16 %v803_v9, %v803_v9  ;;  %v2861_v42 = vld [vmem:[#allocation2 + $0x370] sm:$0xff]  }
 0x436   :  { %2556 = vmatprep.subr.bf16.mxu1 %v2818_v56  ;;  %v853_v56 = vpack.c.bf16 %v815_v27, %v815_v27 }
 0x438   :  { %2535 = vmatpush3.bf16.msra.mxu0 %v2819_v58  ;;  %v855_v58 = vpack.c.bf16 %v823_v63, %v823_v63 }
 0x439   :  { %2557 = vmatpush3.bf16.msra.mxu1 %v2820_v59  ;;  %2536 = vmatprep.subr.bf16.mxu0 %v2821_v43  ;;  %v2864_v59 = vld [vmem:[#allocation2 + $0x3b0] sm:$0xff]   ;;  %v2865_v43 = vld [vmem:[#allocation2 + $0x368] sm:$0xff]  }
 0x43a   :  { %2558 = vmatprep.subr.bf16.mxu1 %v2822_v46  ;;  %v2866_v46 = vld [vmem:[#allocation2 + $0x3e8] sm:$0xff]  }
 0x43c   :  { %2537 = vmatpush3.bf16.msra.mxu0 %v2823_v13  ;;  %v2869_v13 = vld [vmem:[#allocation2 + $0x360] sm:$0xff]  }
 0x43d   :  { %2559 = vmatpush3.bf16.msra.mxu1 %v2824_v61  ;;  %2566 = vmatprep.subr.bf16.mxu0 %v2825_v0  ;;  %v2870_v61 = vld [vmem:[#allocation2 + $0x3e0] sm:$0xff]  }
 0x43e   :  { %2588 = vmatprep.subr.bf16.mxu1 %v2826_v49  ;;  %v2871_v0 = vld [vmem:[#allocation2 + $0x320] sm:$0xff]   ;;  %v2874_v49 = vld [vmem:[#allocation2 + $0x3d8] sm:$0xff]  }
 0x43f   :  { %1994 = vmatmul.mubr.bf16.vlgmr.msra.gmra.mxu0 %v844_v62  ;;  %v2872_v62 = vld [vmem:[#allocation2 + $0x3a0] sm:$0xff]  }
 0x440   :  { %2034 = vmatmul.mubr.bf16.vlgmr.msra.gmra.mxu1 %v846_v2  ;;  %2567 = vmatpush3.bf16.msra.mxu0 %v2827_v23  ;;  %v2873_v2 = vld [vmem:[#allocation2 + $0x358] sm:$0xff]  }
 0x441   :  { %2589 = vmatpush3.bf16.msra.mxu1 %v2828_v6  ;;  %2568 = vmatprep.subr.bf16.mxu0 %v2829_v10  ;;  %v2875_v23 = vld [vmem:[#allocation2 + $0x318] sm:$0xff]   ;;  %v2877_v10 = vld [vmem:[#allocation2 + $0x350] sm:$0xff]  }
 0x442   :  { %2590 = vmatprep.subr.bf16.mxu1 %v2830_v15  ;;  %2073 = vmatprep.mubr.bf16.mxu0 %v849_v50  ;;  %v2876_v6 = vld [vmem:[#allocation2 + $0x398] sm:$0xff]   ;;  %v2878_v15 = vld [vmem:[#allocation2 + $0x3d0] sm:$0xff]  }
 0x443   :  { %2113 = vmatprep.mubr.bf16.mxu1 %v851_v53 }
 0x444   :  { %2569 = vmatpush3.bf16.msra.mxu0 %v2831_v16  ;;  %v2879_v16 = vld [vmem:[#allocation2 + $0x310] sm:$0xff]  }
 0x445   :  { %2591 = vmatpush3.bf16.msra.mxu1 %v2832_v17  ;;  %2570 = vmatprep.subr.bf16.mxu0 %v2833_v20  ;;  %v2880_v17 = vld [vmem:[#allocation2 + $0x390] sm:$0xff]   ;;  %v2881_v20 = vld [vmem:[#allocation2 + $0x348] sm:$0xff]  }
 0x446   :  { %2592 = vmatprep.subr.bf16.mxu1 %v2834_v22  ;;  %v2882_v22 = vld [vmem:[#allocation2 + $0x3c8] sm:$0xff]  }
 0x448   :  { %2571 = vmatpush3.bf16.msra.mxu0 %v2835_v24  ;;  %v2883_v24 = vld [vmem:[#allocation2 + $0x308] sm:$0xff]  }
 0x449   :  { %2593 = vmatpush3.bf16.msra.mxu1 %v2836_v1  ;;  %2572 = vmatprep.subr.bf16.mxu0 %v2837_v28  ;;  %v2884_v1 = vld [vmem:[#allocation2 + $0x388] sm:$0xff]   ;;  %v2885_v28 = vld [vmem:[#allocation2 + $0x340] sm:$0xff]  }
 0x44a   :  { %2594 = vmatprep.subr.bf16.mxu1 %v2838_v31  ;;  %v2886_v31 = vld [vmem:[#allocation2 + $0x3c0] sm:$0xff]  }
 0x44c   :  { %2573 = vmatpush3.bf16.msra.mxu0 %v2839_v30  ;;  %v811_v30 = vrot.slane %v3945_v41, %v778_v55  ;;  %v2889_v55 = vld [vmem:[%s3995_s9 + $0x8] sm:$0xff]  }
 0x44d   :  { %2595 = vmatpush3.bf16.msra.mxu1 %v2840_v32  ;;  %2574 = vmatprep.subr.bf16.mxu0 %v2841_v33  ;;  %v819_v32 = vrot.slane %v3945_v41, %v786_v57  ;;  %v2887_v33 = vld [vmem:[#allocation2 + $0x300] sm:$0xff]  }
 0x44e   :  { %2596 = vmatprep.subr.bf16.mxu1 %v2842_v25  ;;  %v2888_v25 = vld [vmem:[#allocation2 + $0x380] sm:$0xff]  }
 0x450   :  { %2575 = vmatpush3.bf16.msra.mxu0 %v2843_v26  ;;  %v852_v26 = vpack.c.bf16 %v811_v30, %v811_v30 }
 0x451   :  { %2597 = vmatpush3.bf16.msra.mxu1 %v2844_v34  ;;  %2576 = vmatprep.subr.bf16.mxu0 %v2845_v35  ;;  %v854_v34 = vpack.c.bf16 %v819_v32, %v819_v32  ;;  %v2927_v35 = vmov 0.0  }
 0x452   :  { %2598 = vmatprep.subr.bf16.mxu1 %v2846_v36 }
 0x454   :  { %2577 = vmatpush3.bf16.msra.mxu0 %v2847_v37  ;;  %v1112_v37 = vld [vmem:[%s3994_s8] sm:$0x1] }
 0x455   :  { %2599 = vmatpush3.bf16.msra.mxu1 %v2848_v38  ;;  %2578 = vmatprep.subr.bf16.mxu0 %v2849_v39 }
 0x456   :  { %2600 = vmatprep.subr.bf16.mxu1 %v2850_v29 }
 0x458   :  { %2579 = vmatpush3.bf16.msra.mxu0 %v2851_v40 }
 0x459   :  { %2601 = vmatpush3.bf16.msra.mxu1 %v2852_v44  ;;  %2580 = vmatprep.subr.bf16.mxu0 %v2853_v7 }
 0x45a   :  { %2602 = vmatprep.subr.bf16.mxu1 %v2854_v45 }
 0x45c   :  { %2581 = vmatpush3.bf16.msra.mxu0 %v2855_v47 }
 0x45d   :  { %2603 = vmatpush3.bf16.msra.mxu1 %v2856_v48  ;;  %2610 = vmatprep.subr.bf16.mxu0 %v2857_v14 }
 0x45e   :  { %2632 = vmatprep.subr.bf16.mxu1 %v2858_v52 }
 0x45f   :  { %2074 = vmatmul.mubr.bf16.vlgmr.msra.gmra.mxu0 %v848_v21 }
 0x460   :  { %2114 = vmatmul.mubr.bf16.vlgmr.msra.gmra.mxu1 %v850_v54  ;;  %2611 = vmatpush3.bf16.msra.mxu0 %v2859_v4 }
 0x461   :  { %2633 = vmatpush3.bf16.msra.mxu1 %v2860_v5  ;;  %2612 = vmatprep.subr.bf16.mxu0 %v2861_v42 }
 0x462   :  { %2634 = vmatprep.subr.bf16.mxu1 %v2862_v8  ;;  %2153 = vmatprep.mubr.bf16.mxu0 %v853_v56 }
 0x463   :  { %2193 = vmatprep.mubr.bf16.mxu1 %v855_v58 }
 0x464   :  { %2613 = vmatpush3.bf16.msra.mxu0 %v2863_v12 }
 0x465   :  { %2635 = vmatpush3.bf16.msra.mxu1 %v2864_v59  ;;  %2614 = vmatprep.subr.bf16.mxu0 %v2865_v43 }
 0x466   :  { %2636 = vmatprep.subr.bf16.mxu1 %v2866_v46 }
 0x468   :  { %2615 = vmatpush3.bf16.msra.mxu0 %v2867_v3 }
 0x469   :  { %2637 = vmatpush3.bf16.msra.mxu1 %v2868_v11  ;;  %2616 = vmatprep.subr.bf16.mxu0 %v2869_v13 }
 0x46a   :  { %2638 = vmatprep.subr.bf16.mxu1 %v2870_v61 }
 0x46c   :  { %2617 = vmatpush3.bf16.msra.mxu0 %v2871_v0 }
 0x46d   :  { %2639 = vmatpush3.bf16.msra.mxu1 %v2872_v62  ;;  %2618 = vmatprep.subr.bf16.mxu0 %v2873_v2 }
 0x46e   :  { %2640 = vmatprep.subr.bf16.mxu1 %v2874_v49 }
 0x470   :  { %2619 = vmatpush3.bf16.msra.mxu0 %v2875_v23 }
 0x471   :  { %2641 = vmatpush3.bf16.msra.mxu1 %v2876_v6  ;;  %2620 = vmatprep.subr.bf16.mxu0 %v2877_v10 }
 0x472   :  { %2642 = vmatprep.subr.bf16.mxu1 %v2878_v15 }
 0x474   :  { %2621 = vmatpush3.bf16.msra.mxu0 %v2879_v16 }
 0x475   :  { %2643 = vmatpush3.bf16.msra.mxu1 %v2880_v17  ;;  %2622 = vmatprep.subr.bf16.mxu0 %v2881_v20 }
 0x476   :  { %2644 = vmatprep.subr.bf16.mxu1 %v2882_v22 }
 0x478   :  { %2623 = vmatpush3.bf16.msra.mxu0 %v2883_v24  ;;  %v2207_v24 = vld [vmem:[%s3996_s10] sm:$0x1] }
 0x479   :  { %2645 = vmatpush3.bf16.msra.mxu1 %v2884_v1  ;;  %2624 = vmatprep.subr.bf16.mxu0 %v2885_v28 }
 0x47a   :  { %2646 = vmatprep.subr.bf16.mxu1 %v2886_v31 }
 0x47c   :  { %2625 = vmatpush3.bf16.msra.mxu0 %v2887_v33 }
 0x47d   :  { %2647 = vmatpush3.bf16.msra.mxu1 %v2888_v25  ;;  %2657 = vmatprep.subr.bf16.mxu0 %v2927_v35 }
 0x47f   :  { %2154 = vmatmul.mubr.bf16.vlgmr.msra.gmra.mxu0 %v852_v26 }
 0x480   :  { %2194 = vmatmul.mubr.bf16.vlgmr.msra.gmra.mxu1 %v854_v34  ;;  %2658 = vmatpush3.bf16.msra.mxu0 %v2889_v55 }
 0x481   :  { %2659 = vmatprep.subr.bf16.mxu0 %v2927_v35  ;;  %2661 = vmatprep.mubr.msk.bf16.mxu0 %vm2928_vm2, %v2927_v35 }
 0x484   :  { %2660 = vmatpush3.bf16.msra.mxu0 %v2890_v60 }
 0x4df   :  { %v2494_v57 = vpop.f32.mrf.mxu0 }
 0x4e0   :  { %v2516_v36 = vpop.f32.mrf.mxu1 }
 0x4e1   :  { %v2495_v38 = vpop.f32.mrf.mxu0 }
 0x4e2   :  { %v2517_v39 = vpop.f32.mrf.mxu1  ;;  %v2496_v29 = vadd.f32 %v2495_v38, %v2494_v57 }
 0x4e3   :  { %v2518_v40 = vadd.f32 %v2517_v39, %v2516_v36  ;;  %v2497_v44 = vpop.f32.mrf.mxu0 }
 0x4e4   :  { %v2519_v7 = vpop.f32.mrf.mxu1  ;;  %v1916_v45 = vadd.f32 %v2496_v29, %v1112_v37 }
 0x4e5   :  { %v2498_v47 = vpop.f32.mrf.mxu0 }
 0x4e6   :  { %v2520_v48 = vpop.f32.mrf.mxu1  ;;  %v1956_v41 = vadd.f32 %v2518_v40, %v1916_v45 }
 0x4ff   :  { %v2538_v18 = vpop.f32.mrf.mxu0 }
 0x500   :  { %v2560_v19 = vpop.f32.mrf.mxu1 }
 0x501   :  { %v2539_v51 = vpop.f32.mrf.mxu0 }
 0x502   :  { %v2561_v9 = vpop.f32.mrf.mxu1  ;;  %v2540_v58 = vadd.f32 %v2539_v51, %v2538_v18 }
 0x503   :  { %v2541_v14 = vpop.f32.mrf.mxu0  ;;  %v2562_v12 = vadd.f32 %v2561_v9, %v2560_v19 }
 0x504   :  { %v2563_v52 = vpop.f32.mrf.mxu1  ;;  %v1996_v8 = vadd.f32 %v2540_v58, %v1956_v41 }
 0x505   :  { %v2542_v27 = vpop.f32.mrf.mxu0 }
 0x506   :  { %v2564_v63 = vpop.f32.mrf.mxu1  ;;  %v2036_v43 = vadd.f32 %v2562_v12, %v1996_v8 }
 0x51f   :  { %v2582_v50 = vpop.f32.mrf.mxu0 }
 0x520   :  { %v2604_v53 = vpop.f32.mrf.mxu1 }
 0x521   :  { %v2583_v21 = vpop.f32.mrf.mxu0 }
 0x522   :  { %v2605_v4 = vpop.f32.mrf.mxu1  ;;  %v2584_v59 = vadd.f32 %v2583_v21, %v2582_v50 }
 0x523   :  { %v2585_v54 = vpop.f32.mrf.mxu0  ;;  %v2606_v3 = vadd.f32 %v2605_v4, %v2604_v53 }
 0x524   :  { %v2607_v5 = vpop.f32.mrf.mxu1  ;;  %v2076_v46 = vadd.f32 %v2584_v59, %v2036_v43 }
 0x525   :  { %v2586_v42 = vpop.f32.mrf.mxu0 }
 0x526   :  { %v2608_v56 = vpop.f32.mrf.mxu1  ;;  %v2116_v62 = vadd.f32 %v2606_v3, %v2076_v46 }
 0x53f   :  { %v2626_v11 = vpop.f32.mrf.mxu0 }
 0x540   :  { %v2648_v13 = vpop.f32.mrf.mxu1 }
 0x541   :  { %v2627_v61 = vpop.f32.mrf.mxu0 }
 0x542   :  { %v2649_v0 = vpop.f32.mrf.mxu1  ;;  %v2628_v2 = vadd.f32 %v2627_v61, %v2626_v11 }
 0x543   :  { %v2629_v49 = vpop.f32.mrf.mxu0  ;;  %v2650_v10 = vadd.f32 %v2649_v0, %v2648_v13 }
 0x544   :  { %v2651_v23 = vpop.f32.mrf.mxu1  ;;  %v2156_v6 = vadd.f32 %v2628_v2, %v2116_v62 }
 0x545   :  { %v2630_v15 = vpop.f32.mrf.mxu0 }
 0x546   :  { %v2652_v16 = vpop.f32.mrf.mxu1  ;;  %v2196_v17 = vadd.f32 %v2650_v10, %v2156_v6 }
 0x548   :  { %v2201_v20 = vmax.f32 %v2196_v17, 0.0 }
 0x54a   :  { %v2202_v22 = vpack.c.bf16 %v2201_v20, %v2201_v20 }
 0x54c   :  { %2662 = vmatmul.mubr.msk.bf16.vlgmr.msra.gmra.mxu0 %vm2220_vm14, %v2202_v22 }
 0x60c   :  { %v2258_v1 = vpop.f32.mrf.mxu0 }
 0x60d   :  { %v2259_v28 = vadd.f32 %v2258_v1, %v2207_v24 }
 0x60e   :  { %v2663_v31 = vpop.f32.mrf.mxu0 }
 0x60f   :  { %2265 = vst.msk [vmem:[#allocation6] sm:$0x1] %vm2264_vm10, %v2259_v28 }
 0x610   :  { %v2261_v30 = vpop.f32.mrf.mxu0 }
 0x611   :  { %2902 = shalt.err (!%p2899_p4)
}
 0x612   :  { %2275 = dma.vmem_to_hbm [thread:$0]  %s2273_s15, 16, %s3997_s11, [#allocation7]   ;;  %v2664_v32 = vpop.f32.mrf.mxu0 }
 0x613   :  { %2913 = dma.done.wait [#allocation7], 16  }
 0x614   :  { %2914 = vsyncadd [#allocation7], 4294967280 }
 0x615   :  { %2279 = vsyncpa [#allocation7], 1 }
 0x616   :  { %2280 = vsyncmov [#allocation5] }
 0x619   :  { %s2281_s10 = vpop.sfrf %2280 }
 0x61a   :  { %p2477_p5 = scmp.ne.s32.totalorder %s2281_s10, 0 }
 0x61c   :  { %2285 = shalt.err (%p2477_p5)  }

</bundles_post_ra>
